<compile_context>
chip_gen: v7x
topology: tpu7x:2x2x1
jax: 0.10.0
libtpu: 0.0.40
codegen_flags: <defaults>
</compile_context>

<pallas_src>
import functools

import jax
import jax.numpy as jnp
import numpy as np
from jax import lax
from jax.experimental import pallas as pl
from jax.experimental.pallas import tpu as pltpu


def qa_lstm_kernel(ids_ref, emb_ref, wih_ref, whh_ref, b_ref,
                   wlinq_ref, wlina_ref, blin_ref, out_ref, gx_ref,
                   *, T, B, R):
    """Fused hot path: in-kernel embedding gather (one-hot MXU matmul),
    hoisted input projection into VMEM scratch, padded 8-row fused-batch LSTM
    recurrence (fully unrolled), max-pool over time, concat-free final linear,
    log-softmax.

    ids_ref  : [T*R, 1]   int32, time-major fused batch; row t*R+j = step t of
                          fused sample j (j<B: question, B<=j<2B: answer,
                          j>=2B: zero padding rows, discarded).
    emb_ref  : [Vpad, E]  bf16, vocab lane-padded embedding table.
    wih_ref  : [E, 4H]    bf16, gate columns permuted to i|f|o|g.
    whh_ref  : [H, 4H]    bf16, same permutation.
    b_ref    : [1, 4H]    f32, (b_ih + b_hh), same permutation.
    wlinq_ref: [H, 2]     f32, first half of Linear weight (question features).
    wlina_ref: [H, 2]     f32, second half (answer features).
    blin_ref : [1, 2]     f32.
    out_ref  : [B, 2]     f32 log-probabilities.
    gx_ref   : [T*R, 4H]  f32 VMEM scratch for hoisted gate pre-activations.
    """
    H = whh_ref.shape[0]
    Vpad = emb_ref.shape[0]
    TR = T * R

    # --- In-kernel embedding gather as a one-hot MXU matmul (exact: one-hot is
    #     0/1 and accumulation is f32, so rows equal the bf16 embedding values).
    ids = ids_ref[...]                                           # [T*R, 1] i32
    onehot = (ids == lax.broadcasted_iota(jnp.int32, (TR, Vpad), 1)
              ).astype(emb_ref.dtype)                            # [T*R, Vpad] bf16
    x = jnp.dot(onehot, emb_ref[...],
                preferred_element_type=jnp.float32)              # [T*R, E] f32

    # --- Hoisted input projection: ONE matmul for all timesteps, bias folded
    #     in once. Stored in VMEM scratch so only one [R, 4H] tile is live in
    #     vregs per unrolled step.
    gx_ref[...] = (jnp.dot(x.astype(wih_ref.dtype), wih_ref[...],
                           preferred_element_type=jnp.float32)
                   + b_ref[...])                                 # [T*R, 4H] f32

    h = jnp.zeros((R, H), jnp.float32)
    c = jnp.zeros((R, H), jnp.float32)
    mx = None

    # --- Fully unrolled recurrence (T small & static). Only h @ W_hh and the
    #     gate elementwise math remain on the serial critical path.
    for t in range(T):
        g_x = gx_ref[pl.ds(t * R, R), :]                         # aligned (8,128) tiles
        if t == 0:
            gates = g_x                                          # h == 0
        else:
            gates = g_x + jnp.dot(h.astype(whh_ref.dtype), whh_ref[...],
                                  preferred_element_type=jnp.float32)
        # Gate order i|f|o|g: one wide sigmoid, one tanh per step.
        sg = jax.nn.sigmoid(gates[:, 0:3 * H])                   # [R, 3H]
        i_g = sg[:, 0:H]
        f_g = sg[:, H:2 * H]
        o_g = sg[:, 2 * H:3 * H]
        g_g = jnp.tanh(gates[:, 3 * H:4 * H])
        c = f_g * c + i_g * g_g
        h = o_g * jnp.tanh(c)
        mx = h if t == 0 else jnp.maximum(mx, h)                 # max over time

    # --- Concat-free final linear: logits = mx_q @ Wq + mx_a @ Wa + b.
    #     (Dropout(dropout_linear) is identity in eval mode.)
    logits = (jnp.dot(mx[:B, :], wlinq_ref[...],
                      preferred_element_type=jnp.float32)
              + jnp.dot(mx[B:2 * B, :], wlina_ref[...],
                        preferred_element_type=jnp.float32)
              + blin_ref[...])                                   # [B, 2]

    # LogSoftmax(dim=1), numerically stable.
    m = jnp.max(logits, axis=1, keepdims=True)
    z = logits - m
    out_ref[...] = z - jnp.log(jnp.sum(jnp.exp(z), axis=1, keepdims=True))


def qa_lstm_forward(q_ids, a_ids, params, matmul_dtype=jnp.bfloat16):
    """Glue: integer-only input prep (fused/padded time-major ids) + parameter
    re-layout (gate permutation, vocab lane padding), then one pallas_call.
    All floats are produced inside the kernel."""
    B, T = q_ids.shape
    V, E = params['emb'].shape
    H = params['whh'].shape[1]
    R = ((2 * B + 7) // 8) * 8                 # fused batch padded to sublane tile

    # Fused, padded, time-major ids: row t*R + j is timestep t of fused sample j.
    ids = jnp.concatenate(
        [q_ids, a_ids, jnp.zeros((R - 2 * B, T), jnp.int32)], axis=0)  # [R, T]
    ids_tm = ids.T.reshape(T * R, 1).astype(jnp.int32)                 # [T*R, 1]

    # Vocab padded to a lane multiple so the one-hot gather matmul is whole-tile.
    Vpad = ((V + 127) // 128) * 128
    emb = jnp.pad(params['emb'].astype(matmul_dtype),
                  ((0, Vpad - V), (0, 0)))                             # [Vpad, E]

    # Gate-column permutation: torch i|f|g|o  ->  i|f|o|g.
    perm = jnp.concatenate([jnp.arange(0, 2 * H),
                            jnp.arange(3 * H, 4 * H),
                            jnp.arange(2 * H, 3 * H)])
    wih_t = params['wih'].T[:, perm].astype(matmul_dtype)              # [E, 4H]
    whh_t = params['whh'].T[:, perm].astype(matmul_dtype)              # [H, 4H]
    b = (params['b_ih'] + params['b_hh'])[perm][None, :].astype(jnp.float32)
    wlin_t = params['wlin'].T.astype(jnp.float32)                      # [2H, 2]
    wlin_q = wlin_t[:H, :]                                             # [H, 2]
    wlin_a = wlin_t[H:, :]                                             # [H, 2]
    blin = params['blin'][None, :].astype(jnp.float32)                 # [1, 2]

    def full(shape):
        zeros = (0,) * len(shape)
        return pl.BlockSpec(shape, lambda i: zeros)

    kernel = functools.partial(qa_lstm_kernel, T=T, B=B, R=R)
    return pl.pallas_call(
        kernel,
        out_shape=jax.ShapeDtypeStruct((B, 2), jnp.float32),
        grid=(1,),
        in_specs=[full(ids_tm.shape), full(emb.shape), full(wih_t.shape),
                  full(whh_t.shape), full(b.shape), full(wlin_q.shape),
                  full(wlin_a.shape), full(blin.shape)],
        out_specs=full((B, 2)),
        scratch_shapes=[pltpu.VMEM((T * R, 4 * H), jnp.float32)],
        compiler_params=pltpu.CompilerParams(
            dimension_semantics=("arbitrary",)),
    )(ids_tm, emb, wih_t, whh_t, b, wlin_q, wlin_a, blin)


def reference_forward(q_ids, a_ids, params, matmul_dtype=jnp.float32):
    """Pure-JAX reference mirroring the PyTorch forward (eval mode).
    matmul_dtype=f32 reproduces the exact module semantics; bf16 mirrors the
    kernel's MXU operand rounding for a tight structural check."""
    emb = params['emb']
    wih = params['wih'].T.astype(matmul_dtype)                  # [E, 4H]
    whh = params['whh'].T.astype(matmul_dtype)                  # [H, 4H]
    b = (params['b_ih'] + params['b_hh'])[None, :]
    H = params['whh'].shape[1]

    def cell(carry, x_t):
        h, c = carry
        gates = (jnp.dot(x_t.astype(matmul_dtype), wih,
                         preferred_element_type=jnp.float32)
                 + jnp.dot(h.astype(matmul_dtype), whh,
                           preferred_element_type=jnp.float32)
                 + b)
        i_g = jax.nn.sigmoid(gates[:, :H])
        f_g = jax.nn.sigmoid(gates[:, H:2 * H])
        g_g = jnp.tanh(gates[:, 2 * H:3 * H])
        o_g = jax.nn.sigmoid(gates[:, 3 * H:])
        c = f_g * c + i_g * g_g
        h = o_g * jnp.tanh(c)
        return (h, c), h

    def lstm_max(ids):
        x = jnp.take(emb, ids, axis=0)                          # [B, T, E]
        Bb = x.shape[0]
        init = (jnp.zeros((Bb, H), jnp.float32),
                jnp.zeros((Bb, H), jnp.float32))
        _, hs = lax.scan(cell, init, jnp.transpose(x, (1, 0, 2)))
        return jnp.max(hs, axis=0)

    feat = jnp.concatenate([lstm_max(q_ids), lstm_max(a_ids)], axis=1)
    logits = feat @ params['wlin'].T + params['blin']
    return jax.nn.log_softmax(logits, axis=1)


def init_params(key, vocab_size, embedding_dim, hidden_size):
    ks = jax.random.split(key, 7)
    H = hidden_size
    s = 1.0 / np.sqrt(H)
    return {
        'emb': jax.random.normal(ks[0], (vocab_size, embedding_dim), jnp.float32),
        'wih': jax.random.uniform(ks[1], (4 * H, embedding_dim), jnp.float32, -s, s),
        'whh': jax.random.uniform(ks[2], (4 * H, H), jnp.float32, -s, s),
        'b_ih': jax.random.uniform(ks[3], (4 * H,), jnp.float32, -s, s),
        'b_hh': jax.random.uniform(ks[4], (4 * H,), jnp.float32, -s, s),
        'wlin': jax.random.uniform(ks[5], (2, 2 * H), jnp.float32, -s, s),
        'blin': jax.random.uniform(ks[6], (2,), jnp.float32, -s, s),
    }


if __name__ == "__main__":
    # H chosen as a multiple of 128 so every LSTM gate is a whole-vreg lane slice.
    VOCAB, E, H, B, T = 50, 64, 128, 2, 8
    key = jax.random.PRNGKey(0)
    k_params, k_q, k_a = jax.random.split(key, 3)

    params = init_params(k_params, VOCAB, E, H)
    q_ids = jax.random.randint(k_q, (B, T), 0, VOCAB, dtype=jnp.int32)
    a_ids = jax.random.randint(k_a, (B, T), 0, VOCAB, dtype=jnp.int32)

    out = jax.block_until_ready(qa_lstm_forward(q_ids, a_ids, params))

    # Structural check: reference with identical bf16 matmul-operand rounding.
    ref_bf16 = jax.block_until_ready(
        reference_forward(q_ids, a_ids, params, matmul_dtype=jnp.bfloat16))
    np.testing.assert_allclose(np.asarray(out), np.asarray(ref_bf16),
                               rtol=1e-3, atol=1e-3)

    # Semantic check vs. the f32 PyTorch-equivalent forward (loose tolerance
    # accounts for bf16 MXU operands on the LSTM path).
    ref_f32 = jax.block_until_ready(reference_forward(q_ids, a_ids, params))
    np.testing.assert_allclose(np.asarray(out), np.asarray(ref_f32),
                               rtol=5e-2, atol=5e-2)

    print("KERNEL_OK")
</pallas_src>

<mosaic_0001>
module attributes {stable_mosaic.version = 11 : i64} {
  func.func @qa_lstm_kernel(%arg0: i32, %arg1: memref<64x1xi32, #tpu.memory_space<vmem>>, %arg2: memref<128x64xbf16, #tpu.memory_space<vmem>>, %arg3: memref<64x512xbf16, #tpu.memory_space<vmem>>, %arg4: memref<128x512xbf16, #tpu.memory_space<vmem>>, %arg5: memref<1x512xf32, #tpu.memory_space<vmem>>, %arg6: memref<128x2xf32, #tpu.memory_space<vmem>>, %arg7: memref<128x2xf32, #tpu.memory_space<vmem>>, %arg8: memref<1x2xf32, #tpu.memory_space<vmem>>, %arg9: memref<2x2xf32, #tpu.memory_space<vmem>>, %arg10: memref<64x512xf32, #tpu.memory_space<vmem>>) attributes {dimension_semantics = [#tpu.dimension_semantics<arbitrary>], iteration_bounds = array<i64: 1>, scalar_prefetch = 0 : i64, scratch_operands = 1 : i64, tpu.core_type = #tpu.core_type<tc>, window_params = [{pipeline_mode = #tpu.pipeline_mode<synchronous>, transform_indices = @transform_0, window_bounds = array<i64: 64, 1>}, {pipeline_mode = #tpu.pipeline_mode<synchronous>, transform_indices = @transform_1, window_bounds = array<i64: 128, 64>}, {pipeline_mode = #tpu.pipeline_mode<synchronous>, transform_indices = @transform_2, window_bounds = array<i64: 64, 512>}, {pipeline_mode = #tpu.pipeline_mode<synchronous>, transform_indices = @transform_3, window_bounds = array<i64: 128, 512>}, {pipeline_mode = #tpu.pipeline_mode<synchronous>, transform_indices = @transform_4, window_bounds = array<i64: 1, 512>}, {pipeline_mode = #tpu.pipeline_mode<synchronous>, transform_indices = @transform_5, window_bounds = array<i64: 128, 2>}, {pipeline_mode = #tpu.pipeline_mode<synchronous>, transform_indices = @transform_6, window_bounds = array<i64: 128, 2>}, {pipeline_mode = #tpu.pipeline_mode<synchronous>, transform_indices = @transform_7, window_bounds = array<i64: 1, 2>}, {pipeline_mode = #tpu.pipeline_mode<synchronous>, transform_indices = @transform_8, window_bounds = array<i64: 2, 2>}]} {
    %c0 = arith.constant 0 : index
    %c0_0 = arith.constant 0 : index
    %0 = vector.load %arg1[%c0, %c0_0] : memref<64x1xi32, #tpu.memory_space<vmem>>, vector<64x1xi32>
    %1 = tpu.iota {dimensions = array<i32: 1>} : vector<64x128xi32>
    %2 = vector.broadcast %0 : vector<64x1xi32> to vector<64x128xi32>
    %3 = arith.cmpi eq, %2, %1 : vector<64x128xi32>
    %4 = arith.extui %3 : vector<64x128xi1> to vector<64x128xi32>
    %5 = arith.sitofp %4 : vector<64x128xi32> to vector<64x128xf32>
    %6 = arith.truncf %5 : vector<64x128xf32> to vector<64x128xbf16>
    %c0_1 = arith.constant 0 : index
    %c0_2 = arith.constant 0 : index
    %7 = vector.load %arg2[%c0_1, %c0_2] : memref<128x64xbf16, #tpu.memory_space<vmem>>, vector<128x64xbf16>
    %cst = arith.constant dense<0.000000e+00> : vector<64x64xf32>
    %8 = tpu.matmul %6, %7, %cst {dimension_numbers = #tpu.dot_dimension_numbers<[1], [0], [0], [1], [0, 0, 1, 1], [], []>} : vector<64x128xbf16>, vector<128x64xbf16>, vector<64x64xf32> -> vector<64x64xf32>
    %9 = arith.truncf %8 : vector<64x64xf32> to vector<64x64xbf16>
    %c0_3 = arith.constant 0 : index
    %c0_4 = arith.constant 0 : index
    %10 = vector.load %arg3[%c0_3, %c0_4] : memref<64x512xbf16, #tpu.memory_space<vmem>>, vector<64x512xbf16>
    %cst_5 = arith.constant dense<0.000000e+00> : vector<64x512xf32>
    %11 = tpu.matmul %9, %10, %cst_5 {dimension_numbers = #tpu.dot_dimension_numbers<[1], [0], [0], [1], [0, 0, 1, 1], [], []>} : vector<64x64xbf16>, vector<64x512xbf16>, vector<64x512xf32> -> vector<64x512xf32>
    %c0_6 = arith.constant 0 : index
    %c0_7 = arith.constant 0 : index
    %12 = vector.load %arg5[%c0_6, %c0_7] : memref<1x512xf32, #tpu.memory_space<vmem>>, vector<1x512xf32>
    %13 = vector.broadcast %12 : vector<1x512xf32> to vector<64x512xf32>
    %14 = arith.addf %11, %13 : vector<64x512xf32>
    %c0_8 = arith.constant 0 : index
    %c0_9 = arith.constant 0 : index
    %15 = vector.load %arg10[%c0_8, %c0_9] : memref<64x512xf32, #tpu.memory_space<vmem>>, vector<64x512xf32>
    tpu.vector_store %arg10[%c0_8, %c0_9], %14 {strides = array<i32>} : memref<64x512xf32, #tpu.memory_space<vmem>>, vector<64x512xf32>,
    %cst_10 = arith.constant 0.000000e+00 : f32
    %16 = vector.broadcast %cst_10 : f32 to vector<8x128xf32>
    %c0_11 = arith.constant 0 : index
    %c0_12 = arith.constant 0 : index
    %17 = vector.load %arg10[%c0_11, %c0_12] : memref<64x512xf32, #tpu.memory_space<vmem>>, vector<8x512xf32>
    %18 = vector.extract_strided_slice %17 {offsets = [0, 0], sizes = [8, 384], strides = [1, 1]} : vector<8x512xf32> to vector<8x384xf32>
    %19 = arith.negf %18 : vector<8x384xf32>
    %20 = math.exp %19 : vector<8x384xf32>
    %cst_13 = arith.constant 1.000000e+00 : f32
    %21 = vector.broadcast %cst_13 : f32 to vector<8x384xf32>
    %22 = arith.addf %21, %20 : vector<8x384xf32>
    %23 = arith.divf %21, %22 : vector<8x384xf32>
    %24 = vector.extract_strided_slice %23 {offsets = [0, 0], sizes = [8, 128], strides = [1, 1]} : vector<8x384xf32> to vector<8x128xf32>
    %25 = vector.extract_strided_slice %23 {offsets = [0, 128], sizes = [8, 128], strides = [1, 1]} : vector<8x384xf32> to vector<8x128xf32>
    %26 = vector.extract_strided_slice %23 {offsets = [0, 256], sizes = [8, 128], strides = [1, 1]} : vector<8x384xf32> to vector<8x128xf32>
    %27 = vector.extract_strided_slice %17 {offsets = [0, 384], sizes = [8, 128], strides = [1, 1]} : vector<8x512xf32> to vector<8x128xf32>
    %28 = math.tanh %27 : vector<8x128xf32>
    %29 = arith.mulf %25, %16 : vector<8x128xf32>
    %30 = arith.mulf %24, %28 : vector<8x128xf32>
    %31 = arith.addf %29, %30 : vector<8x128xf32>
    %32 = math.tanh %31 : vector<8x128xf32>
    %33 = arith.mulf %26, %32 : vector<8x128xf32>
    %c8 = arith.constant 8 : index
    %c0_14 = arith.constant 0 : index
    %34 = vector.load %arg10[%c8, %c0_14] : memref<64x512xf32, #tpu.memory_space<vmem>>, vector<8x512xf32>
    %35 = arith.truncf %33 : vector<8x128xf32> to vector<8x128xbf16>
    %c0_15 = arith.constant 0 : index
    %c0_16 = arith.constant 0 : index
    %36 = vector.load %arg4[%c0_15, %c0_16] : memref<128x512xbf16, #tpu.memory_space<vmem>>, vector<128x512xbf16>
    %cst_17 = arith.constant dense<0.000000e+00> : vector<8x512xf32>
    %37 = tpu.matmul %35, %36, %cst_17 {dimension_numbers = #tpu.dot_dimension_numbers<[1], [0], [0], [1], [0, 0, 1, 1], [], []>} : vector<8x128xbf16>, vector<128x512xbf16>, vector<8x512xf32> -> vector<8x512xf32>
    %38 = arith.addf %34, %37 : vector<8x512xf32>
    %39 = vector.extract_strided_slice %38 {offsets = [0, 0], sizes = [8, 384], strides = [1, 1]} : vector<8x512xf32> to vector<8x384xf32>
    %40 = arith.negf %39 : vector<8x384xf32>
    %41 = math.exp %40 : vector<8x384xf32>
    %cst_18 = arith.constant 1.000000e+00 : f32
    %42 = vector.broadcast %cst_18 : f32 to vector<8x384xf32>
    %43 = arith.addf %42, %41 : vector<8x384xf32>
    %44 = arith.divf %42, %43 : vector<8x384xf32>
    %45 = vector.extract_strided_slice %44 {offsets = [0, 0], sizes = [8, 128], strides = [1, 1]} : vector<8x384xf32> to vector<8x128xf32>
    %46 = vector.extract_strided_slice %44 {offsets = [0, 128], sizes = [8, 128], strides = [1, 1]} : vector<8x384xf32> to vector<8x128xf32>
    %47 = vector.extract_strided_slice %44 {offsets = [0, 256], sizes = [8, 128], strides = [1, 1]} : vector<8x384xf32> to vector<8x128xf32>
    %48 = vector.extract_strided_slice %38 {offsets = [0, 384], sizes = [8, 128], strides = [1, 1]} : vector<8x512xf32> to vector<8x128xf32>
    %49 = math.tanh %48 : vector<8x128xf32>
    %50 = arith.mulf %46, %31 : vector<8x128xf32>
    %51 = arith.mulf %45, %49 : vector<8x128xf32>
    %52 = arith.addf %50, %51 : vector<8x128xf32>
    %53 = math.tanh %52 : vector<8x128xf32>
    %54 = arith.mulf %47, %53 : vector<8x128xf32>
    %55 = arith.maximumf %33, %54 : vector<8x128xf32>
    %c16 = arith.constant 16 : index
    %c0_19 = arith.constant 0 : index
    %56 = vector.load %arg10[%c16, %c0_19] : memref<64x512xf32, #tpu.memory_space<vmem>>, vector<8x512xf32>
    %57 = arith.truncf %54 : vector<8x128xf32> to vector<8x128xbf16>
    %c0_20 = arith.constant 0 : index
    %c0_21 = arith.constant 0 : index
    %58 = vector.load %arg4[%c0_20, %c0_21] : memref<128x512xbf16, #tpu.memory_space<vmem>>, vector<128x512xbf16>
    %cst_22 = arith.constant dense<0.000000e+00> : vector<8x512xf32>
    %59 = tpu.matmul %57, %58, %cst_22 {dimension_numbers = #tpu.dot_dimension_numbers<[1], [0], [0], [1], [0, 0, 1, 1], [], []>} : vector<8x128xbf16>, vector<128x512xbf16>, vector<8x512xf32> -> vector<8x512xf32>
    %60 = arith.addf %56, %59 : vector<8x512xf32>
    %61 = vector.extract_strided_slice %60 {offsets = [0, 0], sizes = [8, 384], strides = [1, 1]} : vector<8x512xf32> to vector<8x384xf32>
    %62 = arith.negf %61 : vector<8x384xf32>
    %63 = math.exp %62 : vector<8x384xf32>
    %cst_23 = arith.constant 1.000000e+00 : f32
    %64 = vector.broadcast %cst_23 : f32 to vector<8x384xf32>
    %65 = arith.addf %64, %63 : vector<8x384xf32>
    %66 = arith.divf %64, %65 : vector<8x384xf32>
    %67 = vector.extract_strided_slice %66 {offsets = [0, 0], sizes = [8, 128], strides = [1, 1]} : vector<8x384xf32> to vector<8x128xf32>
    %68 = vector.extract_strided_slice %66 {offsets = [0, 128], sizes = [8, 128], strides = [1, 1]} : vector<8x384xf32> to vector<8x128xf32>
    %69 = vector.extract_strided_slice %66 {offsets = [0, 256], sizes = [8, 128], strides = [1, 1]} : vector<8x384xf32> to vector<8x128xf32>
    %70 = vector.extract_strided_slice %60 {offsets = [0, 384], sizes = [8, 128], strides = [1, 1]} : vector<8x512xf32> to vector<8x128xf32>
    %71 = math.tanh %70 : vector<8x128xf32>
    %72 = arith.mulf %68, %52 : vector<8x128xf32>
    %73 = arith.mulf %67, %71 : vector<8x128xf32>
    %74 = arith.addf %72, %73 : vector<8x128xf32>
    %75 = math.tanh %74 : vector<8x128xf32>
    %76 = arith.mulf %69, %75 : vector<8x128xf32>
    %77 = arith.maximumf %55, %76 : vector<8x128xf32>
    %c24 = arith.constant 24 : index
    %c0_24 = arith.constant 0 : index
    %78 = vector.load %arg10[%c24, %c0_24] : memref<64x512xf32, #tpu.memory_space<vmem>>, vector<8x512xf32>
    %79 = arith.truncf %76 : vector<8x128xf32> to vector<8x128xbf16>
    %c0_25 = arith.constant 0 : index
    %c0_26 = arith.constant 0 : index
    %80 = vector.load %arg4[%c0_25, %c0_26] : memref<128x512xbf16, #tpu.memory_space<vmem>>, vector<128x512xbf16>
    %cst_27 = arith.constant dense<0.000000e+00> : vector<8x512xf32>
    %81 = tpu.matmul %79, %80, %cst_27 {dimension_numbers = #tpu.dot_dimension_numbers<[1], [0], [0], [1], [0, 0, 1, 1], [], []>} : vector<8x128xbf16>, vector<128x512xbf16>, vector<8x512xf32> -> vector<8x512xf32>
    %82 = arith.addf %78, %81 : vector<8x512xf32>
    %83 = vector.extract_strided_slice %82 {offsets = [0, 0], sizes = [8, 384], strides = [1, 1]} : vector<8x512xf32> to vector<8x384xf32>
    %84 = arith.negf %83 : vector<8x384xf32>
    %85 = math.exp %84 : vector<8x384xf32>
    %cst_28 = arith.constant 1.000000e+00 : f32
    %86 = vector.broadcast %cst_28 : f32 to vector<8x384xf32>
    %87 = arith.addf %86, %85 : vector<8x384xf32>
    %88 = arith.divf %86, %87 : vector<8x384xf32>
    %89 = vector.extract_strided_slice %88 {offsets = [0, 0], sizes = [8, 128], strides = [1, 1]} : vector<8x384xf32> to vector<8x128xf32>
    %90 = vector.extract_strided_slice %88 {offsets = [0, 128], sizes = [8, 128], strides = [1, 1]} : vector<8x384xf32> to vector<8x128xf32>
    %91 = vector.extract_strided_slice %88 {offsets = [0, 256], sizes = [8, 128], strides = [1, 1]} : vector<8x384xf32> to vector<8x128xf32>
    %92 = vector.extract_strided_slice %82 {offsets = [0, 384], sizes = [8, 128], strides = [1, 1]} : vector<8x512xf32> to vector<8x128xf32>
    %93 = math.tanh %92 : vector<8x128xf32>
    %94 = arith.mulf %90, %74 : vector<8x128xf32>
    %95 = arith.mulf %89, %93 : vector<8x128xf32>
    %96 = arith.addf %94, %95 : vector<8x128xf32>
    %97 = math.tanh %96 : vector<8x128xf32>
    %98 = arith.mulf %91, %97 : vector<8x128xf32>
    %99 = arith.maximumf %77, %98 : vector<8x128xf32>
    %c32 = arith.constant 32 : index
    %c0_29 = arith.constant 0 : index
    %100 = vector.load %arg10[%c32, %c0_29] : memref<64x512xf32, #tpu.memory_space<vmem>>, vector<8x512xf32>
    %101 = arith.truncf %98 : vector<8x128xf32> to vector<8x128xbf16>
    %c0_30 = arith.constant 0 : index
    %c0_31 = arith.constant 0 : index
    %102 = vector.load %arg4[%c0_30, %c0_31] : memref<128x512xbf16, #tpu.memory_space<vmem>>, vector<128x512xbf16>
    %cst_32 = arith.constant dense<0.000000e+00> : vector<8x512xf32>
    %103 = tpu.matmul %101, %102, %cst_32 {dimension_numbers = #tpu.dot_dimension_numbers<[1], [0], [0], [1], [0, 0, 1, 1], [], []>} : vector<8x128xbf16>, vector<128x512xbf16>, vector<8x512xf32> -> vector<8x512xf32>
    %104 = arith.addf %100, %103 : vector<8x512xf32>
    %105 = vector.extract_strided_slice %104 {offsets = [0, 0], sizes = [8, 384], strides = [1, 1]} : vector<8x512xf32> to vector<8x384xf32>
    %106 = arith.negf %105 : vector<8x384xf32>
    %107 = math.exp %106 : vector<8x384xf32>
    %cst_33 = arith.constant 1.000000e+00 : f32
    %108 = vector.broadcast %cst_33 : f32 to vector<8x384xf32>
    %109 = arith.addf %108, %107 : vector<8x384xf32>
    %110 = arith.divf %108, %109 : vector<8x384xf32>
    %111 = vector.extract_strided_slice %110 {offsets = [0, 0], sizes = [8, 128], strides = [1, 1]} : vector<8x384xf32> to vector<8x128xf32>
    %112 = vector.extract_strided_slice %110 {offsets = [0, 128], sizes = [8, 128], strides = [1, 1]} : vector<8x384xf32> to vector<8x128xf32>
    %113 = vector.extract_strided_slice %110 {offsets = [0, 256], sizes = [8, 128], strides = [1, 1]} : vector<8x384xf32> to vector<8x128xf32>
    %114 = vector.extract_strided_slice %104 {offsets = [0, 384], sizes = [8, 128], strides = [1, 1]} : vector<8x512xf32> to vector<8x128xf32>
    %115 = math.tanh %114 : vector<8x128xf32>
    %116 = arith.mulf %112, %96 : vector<8x128xf32>
    %117 = arith.mulf %111, %115 : vector<8x128xf32>
    %118 = arith.addf %116, %117 : vector<8x128xf32>
    %119 = math.tanh %118 : vector<8x128xf32>
    %120 = arith.mulf %113, %119 : vector<8x128xf32>
    %121 = arith.maximumf %99, %120 : vector<8x128xf32>
    %c40 = arith.constant 40 : index
    %c0_34 = arith.constant 0 : index
    %122 = vector.load %arg10[%c40, %c0_34] : memref<64x512xf32, #tpu.memory_space<vmem>>, vector<8x512xf32>
    %123 = arith.truncf %120 : vector<8x128xf32> to vector<8x128xbf16>
    %c0_35 = arith.constant 0 : index
    %c0_36 = arith.constant 0 : index
    %124 = vector.load %arg4[%c0_35, %c0_36] : memref<128x512xbf16, #tpu.memory_space<vmem>>, vector<128x512xbf16>
    %cst_37 = arith.constant dense<0.000000e+00> : vector<8x512xf32>
    %125 = tpu.matmul %123, %124, %cst_37 {dimension_numbers = #tpu.dot_dimension_numbers<[1], [0], [0], [1], [0, 0, 1, 1], [], []>} : vector<8x128xbf16>, vector<128x512xbf16>, vector<8x512xf32> -> vector<8x512xf32>
    %126 = arith.addf %122, %125 : vector<8x512xf32>
    %127 = vector.extract_strided_slice %126 {offsets = [0, 0], sizes = [8, 384], strides = [1, 1]} : vector<8x512xf32> to vector<8x384xf32>
    %128 = arith.negf %127 : vector<8x384xf32>
    %129 = math.exp %128 : vector<8x384xf32>
    %cst_38 = arith.constant 1.000000e+00 : f32
    %130 = vector.broadcast %cst_38 : f32 to vector<8x384xf32>
    %131 = arith.addf %130, %129 : vector<8x384xf32>
    %132 = arith.divf %130, %131 : vector<8x384xf32>
    %133 = vector.extract_strided_slice %132 {offsets = [0, 0], sizes = [8, 128], strides = [1, 1]} : vector<8x384xf32> to vector<8x128xf32>
    %134 = vector.extract_strided_slice %132 {offsets = [0, 128], sizes = [8, 128], strides = [1, 1]} : vector<8x384xf32> to vector<8x128xf32>
    %135 = vector.extract_strided_slice %132 {offsets = [0, 256], sizes = [8, 128], strides = [1, 1]} : vector<8x384xf32> to vector<8x128xf32>
    %136 = vector.extract_strided_slice %126 {offsets = [0, 384], sizes = [8, 128], strides = [1, 1]} : vector<8x512xf32> to vector<8x128xf32>
    %137 = math.tanh %136 : vector<8x128xf32>
    %138 = arith.mulf %134, %118 : vector<8x128xf32>
    %139 = arith.mulf %133, %137 : vector<8x128xf32>
    %140 = arith.addf %138, %139 : vector<8x128xf32>
    %141 = math.tanh %140 : vector<8x128xf32>
    %142 = arith.mulf %135, %141 : vector<8x128xf32>
    %143 = arith.maximumf %121, %142 : vector<8x128xf32>
    %c48 = arith.constant 48 : index
    %c0_39 = arith.constant 0 : index
    %144 = vector.load %arg10[%c48, %c0_39] : memref<64x512xf32, #tpu.memory_space<vmem>>, vector<8x512xf32>
    %145 = arith.truncf %142 : vector<8x128xf32> to vector<8x128xbf16>
    %c0_40 = arith.constant 0 : index
    %c0_41 = arith.constant 0 : index
    %146 = vector.load %arg4[%c0_40, %c0_41] : memref<128x512xbf16, #tpu.memory_space<vmem>>, vector<128x512xbf16>
    %cst_42 = arith.constant dense<0.000000e+00> : vector<8x512xf32>
    %147 = tpu.matmul %145, %146, %cst_42 {dimension_numbers = #tpu.dot_dimension_numbers<[1], [0], [0], [1], [0, 0, 1, 1], [], []>} : vector<8x128xbf16>, vector<128x512xbf16>, vector<8x512xf32> -> vector<8x512xf32>
    %148 = arith.addf %144, %147 : vector<8x512xf32>
    %149 = vector.extract_strided_slice %148 {offsets = [0, 0], sizes = [8, 384], strides = [1, 1]} : vector<8x512xf32> to vector<8x384xf32>
    %150 = arith.negf %149 : vector<8x384xf32>
    %151 = math.exp %150 : vector<8x384xf32>
    %cst_43 = arith.constant 1.000000e+00 : f32
    %152 = vector.broadcast %cst_43 : f32 to vector<8x384xf32>
    %153 = arith.addf %152, %151 : vector<8x384xf32>
    %154 = arith.divf %152, %153 : vector<8x384xf32>
    %155 = vector.extract_strided_slice %154 {offsets = [0, 0], sizes = [8, 128], strides = [1, 1]} : vector<8x384xf32> to vector<8x128xf32>
    %156 = vector.extract_strided_slice %154 {offsets = [0, 128], sizes = [8, 128], strides = [1, 1]} : vector<8x384xf32> to vector<8x128xf32>
    %157 = vector.extract_strided_slice %154 {offsets = [0, 256], sizes = [8, 128], strides = [1, 1]} : vector<8x384xf32> to vector<8x128xf32>
    %158 = vector.extract_strided_slice %148 {offsets = [0, 384], sizes = [8, 128], strides = [1, 1]} : vector<8x512xf32> to vector<8x128xf32>
    %159 = math.tanh %158 : vector<8x128xf32>
    %160 = arith.mulf %156, %140 : vector<8x128xf32>
    %161 = arith.mulf %155, %159 : vector<8x128xf32>
    %162 = arith.addf %160, %161 : vector<8x128xf32>
    %163 = math.tanh %162 : vector<8x128xf32>
    %164 = arith.mulf %157, %163 : vector<8x128xf32>
    %165 = arith.maximumf %143, %164 : vector<8x128xf32>
    %c56 = arith.constant 56 : index
    %c0_44 = arith.constant 0 : index
    %166 = vector.load %arg10[%c56, %c0_44] : memref<64x512xf32, #tpu.memory_space<vmem>>, vector<8x512xf32>
    %167 = arith.truncf %164 : vector<8x128xf32> to vector<8x128xbf16>
    %c0_45 = arith.constant 0 : index
    %c0_46 = arith.constant 0 : index
    %168 = vector.load %arg4[%c0_45, %c0_46] : memref<128x512xbf16, #tpu.memory_space<vmem>>, vector<128x512xbf16>
    %cst_47 = arith.constant dense<0.000000e+00> : vector<8x512xf32>
    %169 = tpu.matmul %167, %168, %cst_47 {dimension_numbers = #tpu.dot_dimension_numbers<[1], [0], [0], [1], [0, 0, 1, 1], [], []>} : vector<8x128xbf16>, vector<128x512xbf16>, vector<8x512xf32> -> vector<8x512xf32>
    %170 = arith.addf %166, %169 : vector<8x512xf32>
    %171 = vector.extract_strided_slice %170 {offsets = [0, 0], sizes = [8, 384], strides = [1, 1]} : vector<8x512xf32> to vector<8x384xf32>
    %172 = arith.negf %171 : vector<8x384xf32>
    %173 = math.exp %172 : vector<8x384xf32>
    %cst_48 = arith.constant 1.000000e+00 : f32
    %174 = vector.broadcast %cst_48 : f32 to vector<8x384xf32>
    %175 = arith.addf %174, %173 : vector<8x384xf32>
    %176 = arith.divf %174, %175 : vector<8x384xf32>
    %177 = vector.extract_strided_slice %176 {offsets = [0, 0], sizes = [8, 128], strides = [1, 1]} : vector<8x384xf32> to vector<8x128xf32>
    %178 = vector.extract_strided_slice %176 {offsets = [0, 128], sizes = [8, 128], strides = [1, 1]} : vector<8x384xf32> to vector<8x128xf32>
    %179 = vector.extract_strided_slice %176 {offsets = [0, 256], sizes = [8, 128], strides = [1, 1]} : vector<8x384xf32> to vector<8x128xf32>
    %180 = vector.extract_strided_slice %170 {offsets = [0, 384], sizes = [8, 128], strides = [1, 1]} : vector<8x512xf32> to vector<8x128xf32>
    %181 = math.tanh %180 : vector<8x128xf32>
    %182 = arith.mulf %178, %162 : vector<8x128xf32>
    %183 = arith.mulf %177, %181 : vector<8x128xf32>
    %184 = arith.addf %182, %183 : vector<8x128xf32>
    %185 = math.tanh %184 : vector<8x128xf32>
    %186 = arith.mulf %179, %185 : vector<8x128xf32>
    %187 = arith.maximumf %165, %186 : vector<8x128xf32>
    %188 = vector.extract_strided_slice %187 {offsets = [0, 0], sizes = [2, 128], strides = [1, 1]} : vector<8x128xf32> to vector<2x128xf32>
    %c0_49 = arith.constant 0 : index
    %c0_50 = arith.constant 0 : index
    %189 = vector.load %arg6[%c0_49, %c0_50] : memref<128x2xf32, #tpu.memory_space<vmem>>, vector<128x2xf32>
    %cst_51 = arith.constant dense<0.000000e+00> : vector<2x2xf32>
    %190 = tpu.matmul %188, %189, %cst_51 {dimension_numbers = #tpu.dot_dimension_numbers<[1], [0], [0], [1], [0, 0, 1, 1], [], []>} : vector<2x128xf32>, vector<128x2xf32>, vector<2x2xf32> -> vector<2x2xf32>
    %191 = vector.extract_strided_slice %187 {offsets = [2, 0], sizes = [2, 128], strides = [1, 1]} : vector<8x128xf32> to vector<2x128xf32>
    %c0_52 = arith.constant 0 : index
    %c0_53 = arith.constant 0 : index
    %192 = vector.load %arg7[%c0_52, %c0_53] : memref<128x2xf32, #tpu.memory_space<vmem>>, vector<128x2xf32>
    %cst_54 = arith.constant dense<0.000000e+00> : vector<2x2xf32>
    %193 = tpu.matmul %191, %192, %cst_54 {dimension_numbers = #tpu.dot_dimension_numbers<[1], [0], [0], [1], [0, 0, 1, 1], [], []>} : vector<2x128xf32>, vector<128x2xf32>, vector<2x2xf32> -> vector<2x2xf32>
    %194 = arith.addf %190, %193 : vector<2x2xf32>
    %c0_55 = arith.constant 0 : index
    %c0_56 = arith.constant 0 : index
    %195 = vector.load %arg8[%c0_55, %c0_56] : memref<1x2xf32, #tpu.memory_space<vmem>>, vector<1x2xf32>
    %196 = vector.broadcast %195 : vector<1x2xf32> to vector<2x2xf32>
    %197 = arith.addf %194, %196 : vector<2x2xf32>
    %cst_57 = arith.constant dense<0xFF800000> : vector<2xf32>
    %198 = vector.multi_reduction <maximumf>, %197, %cst_57 [1] : vector<2x2xf32> to vector<2xf32>
    %199 = vector.shape_cast %198 : vector<2xf32> to vector<2x1xf32>
    %200 = vector.broadcast %199 : vector<2x1xf32> to vector<2x2xf32>
    %201 = arith.subf %197, %200 : vector<2x2xf32>
    %202 = math.exp %201 : vector<2x2xf32>
    %cst_58 = arith.constant dense<0.000000e+00> : vector<2xf32>
    %203 = vector.multi_reduction <add>, %202, %cst_58 [1] : vector<2x2xf32> to vector<2xf32>
    %204 = vector.shape_cast %203 : vector<2xf32> to vector<2x1xf32>
    %205 = math.log %204 : vector<2x1xf32>
    %206 = vector.broadcast %205 : vector<2x1xf32> to vector<2x2xf32>
    %207 = arith.subf %201, %206 : vector<2x2xf32>
    %c0_59 = arith.constant 0 : index
    %c0_60 = arith.constant 0 : index
    %208 = vector.load %arg9[%c0_59, %c0_60] : memref<2x2xf32, #tpu.memory_space<vmem>>, vector<2x2xf32>
    tpu.vector_store %arg9[%c0_59, %c0_60], %207 {strides = array<i32>} : memref<2x2xf32, #tpu.memory_space<vmem>>, vector<2x2xf32>,
    return
  }
  func.func @transform_0(%arg0: i32) -> (i32, i32) {
    %c0_i32 = arith.constant 0 : i32
    %c0_i32_0 = arith.constant 0 : i32
    %c0_i32_1 = arith.constant 0 : i32
    return %c0_i32, %c0_i32_0 : i32, i32
  }
  func.func @transform_1(%arg0: i32) -> (i32, i32) {
    %c0_i32 = arith.constant 0 : i32
    %c0_i32_0 = arith.constant 0 : i32
    %c0_i32_1 = arith.constant 0 : i32
    return %c0_i32, %c0_i32_0 : i32, i32
  }
  func.func @transform_2(%arg0: i32) -> (i32, i32) {
    %c0_i32 = arith.constant 0 : i32
    %c0_i32_0 = arith.constant 0 : i32
    %c0_i32_1 = arith.constant 0 : i32
    return %c0_i32, %c0_i32_0 : i32, i32
  }
  func.func @transform_3(%arg0: i32) -> (i32, i32) {
    %c0_i32 = arith.constant 0 : i32
    %c0_i32_0 = arith.constant 0 : i32
    %c0_i32_1 = arith.constant 0 : i32
    return %c0_i32, %c0_i32_0 : i32, i32
  }
  func.func @transform_4(%arg0: i32) -> (i32, i32) {
    %c0_i32 = arith.constant 0 : i32
    %c0_i32_0 = arith.constant 0 : i32
    %c0_i32_1 = arith.constant 0 : i32
    return %c0_i32, %c0_i32_0 : i32, i32
  }
  func.func @transform_5(%arg0: i32) -> (i32, i32) {
    %c0_i32 = arith.constant 0 : i32
    %c0_i32_0 = arith.constant 0 : i32
    %c0_i32_1 = arith.constant 0 : i32
    return %c0_i32, %c0_i32_0 : i32, i32
  }
  func.func @transform_6(%arg0: i32) -> (i32, i32) {
    %c0_i32 = arith.constant 0 : i32
    %c0_i32_0 = arith.constant 0 : i32
    %c0_i32_1 = arith.constant 0 : i32
    return %c0_i32, %c0_i32_0 : i32, i32
  }
  func.func @transform_7(%arg0: i32) -> (i32, i32) {
    %c0_i32 = arith.constant 0 : i32
    %c0_i32_0 = arith.constant 0 : i32
    %c0_i32_1 = arith.constant 0 : i32
    return %c0_i32, %c0_i32_0 : i32, i32
  }
  func.func @transform_8(%arg0: i32) -> (i32, i32) {
    %c0_i32 = arith.constant 0 : i32
    %c0_i32_0 = arith.constant 0 : i32
    %c0_i32_1 = arith.constant 0 : i32
    return %c0_i32, %c0_i32_0 : i32, i32
  }
}

</mosaic_0001>

<bundles_post_ra>
// kernel: tpu_custom_call.1
= control target key start
LH: loop header
LB: loop body
LE: loop exit
PB: predicated region body
PF: predicated region fallthrough
CT: control target
= control target key end

     0   :  { %v3299_v2 = vmov 0   ;;  %s3290_s0 = inlined_call_operand.vmem [shape: s32[64,1], index: 0, kind: input, shape index: {}]   ;;  %s3291_s1 = inlined_call_operand.vmem [shape: bf16[128,64], index: 1, kind: input, shape index: {}]   ;;  %s3292_s2 = inlined_call_operand.vmem [shape: bf16[64,512], index: 2, kind: input, shape index: {}]   ;;  %s3293_s3 = inlined_call_operand.vmem [shape: bf16[128,512], index: 3, kind: input, shape index: {}]   ;;  %s3294_s4 = inlined_call_operand.vmem [shape: f32[1,512], index: 4, kind: input, shape index: {}]   ;;  %s3295_s5 = inlined_call_operand.vmem [shape: f32[128,2], index: 5, kind: input, shape index: {}]   ;;  %s3296_s6 = inlined_call_operand.vmem [shape: f32[128,2], index: 6, kind: input, shape index: {}]   ;;  %s3297_s7 = inlined_call_operand.vmem [shape: f32[1,2], index: 7, kind: input, shape index: {}]   ;;  %s3298_s8 = inlined_call_operand.hbm [shape: f32[2,2], index: 8, kind: output, shape index: {}]  }
   0x1   :  { %v33_v0 = vld [vmem:[%s3290_s0 + $0x10] sm:$0xff]  ;;  %v31_v1 = vld [vmem:[%s3290_s0] sm:$0xff]  ;;  %2078 = vset.pattern.permute.xlu1 %v3299_v2  ;;  %2077 = vset.pattern.permute.xlu0 %v3299_v2  ;;  %v34_v3 = vld [vmem:[%s3290_s0 + $0x18] sm:$0xff] }
   0x2   :  { %48 = vperm.xlu1 %2078, %v33_v0   ;;  %42 = vperm.xlu0 %2077, %v31_v1   ;;  %v32_v4 = vld [vmem:[%s3290_s0 + $0x8] sm:$0xff]  ;;  %v2079_v5 = vld [vmem:[%s3291_s1] sm:$0xff]   ;;  %v2081_v9 = vld [vmem:[%s3291_s1 + $0x10] sm:$0xff]  }
   0x3   :  { %389 = vmatprep.mubr.bf16.mxu1 %v3299_v2  ;;  %v2080_v6 = vld [vmem:[%s3291_s1 + $0x8] sm:$0xff]   ;;  %1929 = vmatprep.subr.bf16.mxu0 %v2079_v5  ;;  %v35_v8 = vld [vmem:[%s3290_s0 + $0x20] sm:$0xff]  ;;  %v38_v10 = vld [vmem:[%s3290_s0 + $0x38] sm:$0xff] }
   0x4   :  { %v36_v7 = vld [vmem:[%s3290_s0 + $0x28] sm:$0xff]  ;;  %1930 = vmatpush3.bf16.msra.mxu0 %v2079_v5  ;;  %v37_v11 = vld [vmem:[%s3290_s0 + $0x30] sm:$0xff]  ;;  %v2082_v12 = vld [vmem:[%s3291_s1 + $0x18] sm:$0xff]  }
   0x5   :  { %1931 = vmatprep.subr.bf16.mxu0 %v2080_v6  ;;  %v2083_v13 = vld [vmem:[%s3291_s1 + $0x20] sm:$0xff]   ;;  %v2084_v17 = vld [vmem:[%s3291_s1 + $0x28] sm:$0xff]   ;;  %v2085_v20 = vld [vmem:[%s3291_s1 + $0x30] sm:$0xff]  }
   0x6   :  { %51 = vperm.xlu1 %2078, %v34_v3   ;;  %45 = vperm.xlu0 %2077, %v32_v4   ;;  %v2087_v14 = vld [vmem:[%s3292_s2 + $0x4] ss:$16 sps:$4 sm:$0xff]   ;;  %v2092_v15 = vld [vmem:[%s3292_s2] ss:$16 sps:$4 sm:$0xff]   ;;  %v2086_v22 = vld [vmem:[%s3291_s1 + $0x38] sm:$0xff]  }
   0x7   :  { %v2093_v16 = vld [vmem:[%s3292_s2 + $0x24] ss:$16 sps:$4 sm:$0xff]   ;;  %357 = vmatprep.subr.bf16.mxu1 %v2087_v14  ;;  %v2098_v18 = vld [vmem:[%s3292_s2 + $0x20] ss:$16 sps:$4 sm:$0xff]  }
   0x8   :  { %1932 = vmatpush3.bf16.msra.mxu0 %v2080_v6  ;;  %358 = vmatpush1.bf16.msra.mxu1 %v2092_v15  ;;  %v2099_v19 = vld [vmem:[%s3292_s2 + $0x44] ss:$16 sps:$4 sm:$0xff]   ;;  %v2104_v21 = vld [vmem:[%s3292_s2 + $0x40] ss:$16 sps:$4 sm:$0xff]  }
   0x9   :  { %1933 = vmatprep.subr.bf16.mxu0 %v2081_v9  ;;  %359 = vmatprep.subr.bf16.mxu1 %v2093_v16 }
   0xa   :  { %57 = vperm.xlu1 %2078, %v36_v7   ;;  %54 = vperm.xlu0 %2077, %v35_v8  }
   0xc   :  { %1934 = vmatpush3.bf16.msra.mxu0 %v2081_v9  ;;  %360 = vmatpush1.bf16.msra.mxu1 %v2098_v18 }
   0xd   :  { %1935 = vmatprep.subr.bf16.mxu0 %v2082_v12  ;;  %361 = vmatprep.subr.bf16.mxu1 %v2099_v19 }
   0xe   :  { %63 = vperm.xlu1 %2078, %v38_v10   ;;  %60 = vperm.xlu0 %2077, %v37_v11  }
  0x10   :  { %1936 = vmatpush3.bf16.msra.mxu0 %v2082_v12  ;;  %362 = vmatpush1.bf16.msra.mxu1 %v2104_v21 }
  0x11   :  { %1937 = vmatprep.subr.bf16.mxu0 %v2083_v13 }
  0x14   :  { %1938 = vmatpush3.bf16.msra.mxu0 %v2083_v13 }
  0x15   :  { %1939 = vmatprep.subr.bf16.mxu0 %v2084_v17 }
  0x18   :  { %1940 = vmatpush3.bf16.msra.mxu0 %v2084_v17 }
  0x19   :  { %1941 = vmatprep.subr.bf16.mxu0 %v2085_v20 }
  0x1a   :  { %13 = vsyncpa [#allocation4], 0  ;;  %v2091_v23 = vld [vmem:[%s3292_s2 + $0xc] ss:$16 sps:$4 sm:$0xff]   ;;  %v39_v24 = vlaneseq  ;;  %v2089_v30 = vld [vmem:[%s3292_s2 + $0x8] ss:$16 sps:$4 sm:$0xff]  }
  0x1b   :  { %v2097_v31 = vld [vmem:[%s3292_s2 + $0x2c] ss:$16 sps:$4 sm:$0xff]   ;;  %v2346_v32 = vmov 1.0|1.0   ;;  %v2095_v35 = vld [vmem:[%s3292_s2 + $0x28] ss:$16 sps:$4 sm:$0xff]  }
  0x1c   :  { %1942 = vmatpush3.bf16.msra.mxu0 %v2085_v20  ;;  %v40_v27 = vand.u32 127, %v39_v24  ;;  %v2103_v36 = vld [vmem:[%s3292_s2 + $0x4c] ss:$16 sps:$4 sm:$0xff]   ;;  %v2101_v39 = vld [vmem:[%s3292_s2 + $0x48] ss:$16 sps:$4 sm:$0xff]   ;;  %vm344_vm12 = vcmask 523264  }
  0x1d   :  { %1943 = vmatprep.subr.bf16.mxu0 %v2086_v22  ;;  %v2105_v40 = vld [vmem:[%s3292_s2 + $0x64] ss:$16 sps:$4 sm:$0xff]   ;;  %v2109_v41 = vld [vmem:[%s3292_s2 + $0x6c] ss:$16 sps:$4 sm:$0xff]   ;;  %v2107_v42 = vld [vmem:[%s3292_s2 + $0x68] ss:$16 sps:$4 sm:$0xff]  }
  0x1e   :  { %v2110_v43 = vld [vmem:[%s3292_s2 + $0x60] ss:$16 sps:$4 sm:$0xff]   ;;  %363 = vmatprep.subr.bf16.mxu1 %v2105_v40  ;;  %v2516_v56 = vld [vmem:[%s3293_s3 + $0x4] ss:$16 sps:$4 sm:$0xff]   ;;  %v2521_v57 = vld [vmem:[%s3293_s3 + $0xc] ss:$16 sps:$4 sm:$0xff]  }
  0x1f   :  { %364 = vmatpush1.bf16.msra.mxu1 %v2110_v43  ;;  %v2526_v58 = vld [vmem:[%s3293_s3] ss:$16 sps:$4 sm:$0xff]   ;;  %v2531_v59 = vld [vmem:[%s3293_s3 + $0x8] ss:$16 sps:$4 sm:$0xff]   ;;  %v2540_v60 = vld [vmem:[%s3293_s3 + $0x24] ss:$16 sps:$4 sm:$0xff]  }
  0x20   :  { %1944 = vmatpush3.bf16.msra.mxu0 %v2086_v22  ;;  %760 = vmatprep.subr.bf16.mxu1 %v2516_v56  ;;  %v2545_v61 = vld [vmem:[%s3293_s3 + $0x2c] ss:$16 sps:$4 sm:$0xff]   ;;  %v2550_v62 = vld [vmem:[%s3293_s3 + $0x20] ss:$16 sps:$4 sm:$0xff]   ;;  %v2555_v63 = vld [vmem:[%s3293_s3 + $0x28] ss:$16 sps:$4 sm:$0xff]  }
  0x21   :  { %430 = vmatprep.subr.bf16.mxu0 %v2091_v23  ;;  %v2564_v0 = vld [vmem:[%s3293_s3 + $0x44] ss:$16 sps:$4 sm:$0xff]   ;;  %v2569_v1 = vld [vmem:[%s3293_s3 + $0x4c] ss:$16 sps:$4 sm:$0xff]   ;;  %v2574_v3 = vld [vmem:[%s3293_s3 + $0x40] ss:$16 sps:$4 sm:$0xff]  }
  0x22   :  { %v2579_v4 = vld [vmem:[%s3293_s3 + $0x48] ss:$16 sps:$4 sm:$0xff]   ;;  %v2588_v5 = vld [vmem:[%s3293_s3 + $0x64] ss:$16 sps:$4 sm:$0xff]   ;;  %v2593_v6 = vld [vmem:[%s3293_s3 + $0x6c] ss:$16 sps:$4 sm:$0xff]  }
  0x23   :  { %v2598_v7 = vld [vmem:[%s3293_s3 + $0x60] ss:$16 sps:$4 sm:$0xff]   ;;  %v2603_v8 = vld [vmem:[%s3293_s3 + $0x68] ss:$16 sps:$4 sm:$0xff]   ;;  %v2612_v9 = vld [vmem:[%s3293_s3 + $0x84] ss:$16 sps:$4 sm:$0xff]  }
  0x24   :  { %v2617_v10 = vld [vmem:[%s3293_s3 + $0x8c] ss:$16 sps:$4 sm:$0xff]   ;;  %v2622_v11 = vld [vmem:[%s3293_s3 + $0x80] ss:$16 sps:$4 sm:$0xff]   ;;  %v2627_v12 = vld [vmem:[%s3293_s3 + $0x88] ss:$16 sps:$4 sm:$0xff]  }
  0x25   :  { %v2636_v13 = vld [vmem:[%s3293_s3 + $0xa4] ss:$16 sps:$4 sm:$0xff]   ;;  %v2641_v14 = vld [vmem:[%s3293_s3 + $0xa0] ss:$16 sps:$4 sm:$0xff]   ;;  %v2646_v15 = vld [vmem:[%s3293_s3 + $0xac] ss:$16 sps:$4 sm:$0xff]  }
  0x26   :  { %v2651_v16 = vld [vmem:[%s3293_s3 + $0xa8] ss:$16 sps:$4 sm:$0xff]   ;;  %v2656_v17 = vld [vmem:[%s3293_s3 + $0xc4] ss:$16 sps:$4 sm:$0xff]   ;;  %v2663_v18 = vld [vmem:[%s3293_s3 + $0xcc] ss:$16 sps:$4 sm:$0xff]  }
  0x27   :  { %v2670_v19 = vld [vmem:[%s3293_s3 + $0xc0] ss:$16 sps:$4 sm:$0xff]   ;;  %v2675_v20 = vld [vmem:[%s3293_s3 + $0xc8] ss:$16 sps:$4 sm:$0xff]   ;;  %v2682_v21 = vld [vmem:[%s3293_s3 + $0xe4] ss:$16 sps:$4 sm:$0xff]  }
  0x28   :  { %v2687_v22 = vld [vmem:[%s3293_s3 + $0xec] ss:$16 sps:$4 sm:$0xff]   ;;  %v2694_v23 = vld [vmem:[%s3293_s3 + $0xe0] ss:$16 sps:$4 sm:$0xff]   ;;  %vm2348_vm13 = vmmov 0   ;;  %vm1750_vm14 = vcmask 9216  }
  0x29   :  { %s2350_s1 = smov [#allocation3]  }
  0x81   :  { %v49_v25 = vpop.permute.xlu1 %48  ;;  %v43_v26 = vpop.permute.xlu0 %42 }
  0x82   :  { %vm67_vm0 = vcmp.eq.s32.totalorder %v49_v25, %v40_v27  ;;  %vm65_vm3 = vcmp.eq.s32.totalorder %v43_v26, %v40_v27  ;;  %v2699_v25 = vld [vmem:[%s3293_s3 + $0xe8] ss:$16 sps:$4 sm:$0xff]   ;;  %v245_v26 = vshrl.u32 %v39_v24, 7 }
  0x85   :  { %v52_v28 = vpop.permute.xlu1 %51  ;;  %v46_v29 = vpop.permute.xlu0 %45 }
  0x86   :  { %vm68_vm1 = vcmp.eq.s32.totalorder %v52_v28, %v40_v27  ;;  %vm66_vm2 = vcmp.eq.s32.totalorder %v46_v29, %v40_v27  ;;  %v254_v28 = vsub.s32 2, %v245_v26  ;;  %v242_v29 = vld [vmem:[%s3294_s4] sm:$0xf] }
  0x87   :  { %vm1796_vm4 = vmpackc.low %vm68_vm1, %vm67_vm0 }
  0x88   :  { %vm1794_vm5 = vmpackc.low %vm66_vm2, %vm65_vm3 }
  0x89   :  { %1945 = vmatprep.mubr.msk.bf16.mxu0 %vm1794_vm5, %v2346_v32  ;;  %v58_v33 = vpop.permute.xlu1 %57  ;;  %v55_v34 = vpop.permute.xlu0 %54 }
  0x8a   :  { %vm70_vm6 = vcmp.eq.s32.totalorder %v58_v33, %v40_v27  ;;  %1946 = vmatmul.mubr.msk.bf16.vlgmr.msra.gmra.mrb[0].mxu0 %vm1796_vm4, %v2346_v32  ;;  %vm69_vm7 = vcmp.eq.s32.totalorder %v55_v34, %v40_v27  ;;  %v2713_v33 = vrot.slane %v242_v29, %v254_v28 }
  0x8b   :  { %vm1798_vm8 = vmpackc.low %vm70_vm6, %vm69_vm7  ;;  %431 = vmatpush1.bf16.msra.mxu0 %v2089_v30  ;;  %v250_v30 = vsub.s32 1, %v245_v26 }
  0x8c   :  { %1949 = vmatprep.mubr.msk.bf16.mxu0 %vm1798_vm8, %v2346_v32  ;;  %432 = vmatprep.subr.bf16.mxu0 %v2097_v31  ;;  %v258_v31 = vsub.s32 3, %v245_v26 }
  0x8d   :  { %v64_v37 = vpop.permute.xlu1 %63  ;;  %v61_v38 = vpop.permute.xlu0 %60  ;;  %v2715_v34 = vrot.slane %v242_v29, %v250_v30 }
  0x8e   :  { %vm72_vm9 = vcmp.eq.s32.totalorder %v64_v37, %v40_v27  ;;  %vm71_vm10 = vcmp.eq.s32.totalorder %v61_v38, %v40_v27  ;;  %v246_v27 = vsub.s32 0, %v245_v26 }
  0x8f   :  { %vm1800_vm11 = vmpackc.low %vm72_vm9, %vm71_vm10  ;;  %433 = vmatpush1.bf16.msra.mxu0 %v2095_v35  ;;  %v2717_v35 = vrot.slane %v242_v29, %v258_v31 }
  0x90   :  { %434 = vmatprep.subr.bf16.mxu0 %v2103_v36 }
  0x92   :  { %1950 = vmatmul.mubr.msk.bf16.gmra.mrb[4].mxu0 %vm1800_vm11, %v2346_v32  ;;  %v2711_v32 = vrot.slane %v242_v29, %v246_v27 }
  0x93   :  { %435 = vmatpush1.bf16.msra.mxu0 %v2101_v39  ;;  %462 = vmatprep.mubr.bf16.mxu0 %v3299_v2 }
  0x94   :  { %436 = vmatprep.subr.bf16.mxu0 %v2109_v41 }
  0x97   :  { %437 = vmatpush1.bf16.msra.mxu0 %v2107_v42 }
  0x98   :  { %801 = vmatprep.subr.bf16.mxu0 %v2521_v57 }
 0x15d   :  { %v1947_v44 = vpop.f32.mrb[0].mxu0 }
 0x15e   :  { %v191_v45 = vpop.f32.mrb[1].mxu0 }
 0x15f   :  { %v1948_v46 = vpop.f32.mrb[2].mxu0 }
 0x160   :  { %v223_v47 = vpack.c.bf16 %v1948_v46, %v1947_v44  ;;  %v194_v48 = vpop.f32.mrb[3].mxu0 }
 0x161   :  { %v222_v49 = vpack.c.bf16 %v194_v48, %v191_v45 }
 0x163   :  { %1818 = vmatmul.mubr.msk.bf16.vlgmr.msra.gmra.mrb[0].mxu1 %vm344_vm12, %v222_v49  ;;  %1822 = vmatmul.mubr.msk.bf16.vlgmr.msra.gmra.mrb[8].mxu0 %vm344_vm12, %v222_v49 }
 0x164   :  { %399 = vmatprep.mubr.bf16.mxu1 %v3299_v2  ;;  %472 = vmatprep.mubr.bf16.mxu0 %v3299_v2 }
 0x165   :  { %v1951_v50 = vpop.f32.mrb[4].mxu0  ;;  %761 = vmatpush1.bf16.msra.mxu1 %v2526_v58  ;;  %802 = vmatpush1.bf16.msra.mxu0 %v2531_v59 }
 0x166   :  { %v207_v51 = vpop.f32.mrb[5].mxu0  ;;  %762 = vmatprep.subr.bf16.mxu1 %v2540_v60  ;;  %803 = vmatprep.subr.bf16.mxu0 %v2545_v61 }
 0x167   :  { %v1952_v52 = vpop.f32.mrb[6].mxu0 }
 0x168   :  { %v225_v53 = vpack.c.bf16 %v1952_v52, %v1951_v50  ;;  %v210_v54 = vpop.f32.mrb[7].mxu0 }
 0x169   :  { %v224_v55 = vpack.c.bf16 %v210_v54, %v207_v51  ;;  %763 = vmatpush1.bf16.msra.mxu1 %v2550_v62  ;;  %804 = vmatpush1.bf16.msra.mxu0 %v2555_v63 }
 0x16a   :  { %764 = vmatprep.subr.bf16.mxu1 %v2564_v0  ;;  %805 = vmatprep.subr.bf16.mxu0 %v2569_v1 }
 0x16b   :  { %1819 = vmatmul.mubr.msk.bf16.gmra.mrb[4].mxu1 %vm344_vm12, %v223_v47  ;;  %1823 = vmatmul.mubr.msk.bf16.gmra.mrb[12].mxu0 %vm344_vm12, %v223_v47 }
 0x16c   :  { %409 = vmatprep.mubr.bf16.mxu1 %v3299_v2  ;;  %482 = vmatprep.mubr.bf16.mxu0 %v3299_v2 }
 0x16d   :  { %765 = vmatpush1.bf16.msra.mxu1 %v2574_v3  ;;  %806 = vmatpush1.bf16.msra.mxu0 %v2579_v4 }
 0x16e   :  { %766 = vmatprep.subr.bf16.mxu1 %v2588_v5  ;;  %807 = vmatprep.subr.bf16.mxu0 %v2593_v6 }
 0x171   :  { %767 = vmatpush1.bf16.msra.mxu1 %v2598_v7  ;;  %808 = vmatpush1.bf16.msra.mxu0 %v2603_v8 }
 0x172   :  { %768 = vmatprep.subr.bf16.mxu1 %v2612_v9  ;;  %809 = vmatprep.subr.bf16.mxu0 %v2617_v10 }
 0x173   :  { %1820 = vmatmul.mubr.msk.bf16.gmra.mrb[8].mxu1 %vm344_vm12, %v224_v55  ;;  %1824 = vmatmul.mubr.msk.bf16.gmra.mrb[16].mxu0 %vm344_vm12, %v224_v55 }
 0x174   :  { %419 = vmatprep.mubr.bf16.mxu1 %v3299_v2  ;;  %492 = vmatprep.mubr.bf16.mxu0 %v3299_v2 }
 0x175   :  { %769 = vmatpush1.bf16.msra.mxu1 %v2622_v11  ;;  %810 = vmatpush1.bf16.msra.mxu0 %v2627_v12 }
 0x176   :  { %770 = vmatprep.subr.bf16.mxu1 %v2636_v13  ;;  %811 = vmatprep.subr.bf16.mxu0 %v2646_v15 }
 0x179   :  { %771 = vmatpush1.bf16.msra.mxu1 %v2641_v14  ;;  %812 = vmatpush1.bf16.msra.mxu0 %v2651_v16 }
 0x17a   :  { %772 = vmatprep.subr.bf16.mxu1 %v2656_v17  ;;  %813 = vmatprep.subr.bf16.mxu0 %v2663_v18 }
 0x17b   :  { %1821 = vmatmul.mubr.msk.bf16.gmra.mrb[12].mxu1 %vm344_vm12, %v225_v53  ;;  %1825 = vmatmul.mubr.msk.bf16.gmra.mrb[20].mxu0 %vm344_vm12, %v225_v53 }
 0x17c   :  { %792 = vmatprep.mubr.bf16.mxu1 %v3299_v2  ;;  %833 = vmatprep.mubr.bf16.mxu0 %v3299_v2 }
 0x17d   :  { %773 = vmatpush1.bf16.msra.mxu1 %v2670_v19  ;;  %814 = vmatpush1.bf16.msra.mxu0 %v2675_v20 }
 0x17e   :  { %774 = vmatprep.subr.bf16.mxu1 %v2682_v21  ;;  %815 = vmatprep.subr.bf16.mxu0 %v2687_v22 }
 0x181   :  { %775 = vmatpush1.bf16.msra.mxu1 %v2694_v23  ;;  %816 = vmatpush1.bf16.msra.mxu0 %v2699_v25 }
 0x182   :  { %876 = vmatprep.subr.bf16.mxu1 %v2516_v56  ;;  %917 = vmatprep.subr.bf16.mxu0 %v2521_v57 }
 0x236   :  { %v391_v36 = vpop.f32.mrb[0].mxu1  ;;  %v464_v37 = vpop.f32.mrb[8].mxu0 }
 0x237   :  { %v392_v24 = vadd.f32 %v391_v36, %v2711_v32  ;;  %v465_v38 = vadd.f32 %v464_v37, %v2713_v33  ;;  %v393_v39 = vpop.f32.mrb[1].mxu1  ;;  %v466_v40 = vpop.f32.mrb[9].mxu0 }
 0x238   :  { %v394_v41 = vadd.f32 %v393_v39, %v2715_v34  ;;  %v467_v42 = vadd.f32 %v466_v40, %v2717_v35  ;;  %v395_v43 = vpop.f32.mrb[2].mxu1  ;;  %v468_v44 = vpop.f32.mrb[10].mxu0 }
 0x239   :  { %v1826_v45 = vmul.f32 -1.442695, %v392_v24  ;;  %v2724_v46 = vadd.f32 %v395_v43, %v2711_v32  ;;  %v2727_v47 = vadd.f32 %v468_v44, %v2713_v33  ;;  %v397_v48 = vpop.f32.mrb[3].mxu1  ;;  %v470_v49 = vpop.f32.mrb[11].mxu0  ;;  %v1828_v44 = vmul.f32 -1.442695, %v465_v38 }
 0x23a   :  { %v1827_v50 = vmul.f32 -1.442695, %v394_v41  ;;  %v2730_v51 = vadd.f32 %v397_v48, %v2715_v34  ;;  %v2733_v52 = vadd.f32 %v470_v49, %v2717_v35 }
 0x23b   :  { %2159 = vpow2.f32 %v1826_v45 }
 0x23c   :  { %2161 = vpow2.f32 %v1827_v50 }
 0x23d   :  { %2163 = vtanh.f32 %v467_v42 }
 0x23e   :  { %v401_v53 = vpop.f32.mrb[4].mxu1  ;;  %v474_v54 = vpop.f32.mrb[12].mxu0  ;;  %2165 = vpow2.f32 %v1828_v44 }
 0x23f   :  { %v2736_v55 = vadd.f32 %v401_v53, %v2711_v32  ;;  %v2739_v26 = vadd.f32 %v474_v54, %v2713_v33  ;;  %v403_v27 = vpop.f32.mrb[5].mxu1  ;;  %v476_v28 = vpop.f32.mrb[13].mxu0 }
 0x240   :  { %v2742_v29 = vadd.f32 %v403_v27, %v2715_v34  ;;  %v2745_v30 = vadd.f32 %v476_v28, %v2717_v35  ;;  %v405_v31 = vpop.f32.mrb[6].mxu1  ;;  %v478_v36 = vpop.f32.mrb[14].mxu0 }
 0x241   :  { %v2748_v37 = vadd.f32 %v405_v31, %v2711_v32  ;;  %v2751_v24 = vadd.f32 %v478_v36, %v2713_v33  ;;  %v407_v39 = vpop.f32.mrb[7].mxu1  ;;  %v480_v40 = vpop.f32.mrb[15].mxu0 }
 0x242   :  { %v2754_v41 = vadd.f32 %v407_v39, %v2715_v34  ;;  %v2757_v43 = vadd.f32 %v480_v40, %v2717_v35 }
 0x245   :  { %v2160_v45 = vpop.eup %2159 }
 0x246   :  { %v548_v48 = vadd.f32 1.0, %v2160_v45  ;;  %v411_v49 = vpop.f32.mrb[8].mxu1  ;;  %v484_v50 = vpop.f32.mrb[16].mxu0 }
 0x247   :  { %v2162_v53 = vpop.eup %2161  ;;  %v2760_v54 = vadd.f32 %v411_v49, %v2711_v32  ;;  %v2763_v27 = vadd.f32 %v484_v50, %v2713_v33  ;;  %v413_v28 = vpop.f32.mrb[9].mxu1 }
 0x248   :  { %v486_v31 = vpop.f32.mrb[17].mxu0  ;;  %2167 = vrcp.f32 %v548_v48  ;;  %v549_v36 = vadd.f32 1.0, %v2162_v53  ;;  %v2766_v39 = vadd.f32 %v413_v28, %v2715_v34  ;;  %v415_v42 = vpop.f32.mrb[10].mxu1 }
 0x249   :  { %3301 = vst [vmem:[#allocation6_spill] sm:$0xff] %v2760_v54  ;;  %3302 = vst [vmem:[#allocation7_spill] sm:$0xff] %v2763_v27  ;;  %v2769_v38 = vadd.f32 %v486_v31, %v2717_v35  ;;  %v488_v40 = vpop.f32.mrb[18].mxu0  ;;  %v2772_v44 = vadd.f32 %v415_v42, %v2711_v32  ;;  %v417_v49 = vpop.f32.mrb[11].mxu1 }
 0x24a   :  { %3303 = vst [vmem:[#allocation8_spill] sm:$0xff] %v2766_v39  ;;  %v2775_v45 = vadd.f32 %v488_v40, %v2713_v33  ;;  %v490_v50 = vpop.f32.mrb[19].mxu0  ;;  %2169 = vrcp.f32 %v549_v36  ;;  %v2778_v48 = vadd.f32 %v417_v49, %v2715_v34 }
 0x24b   :  { %3304 = vst [vmem:[#allocation9_spill] sm:$0xff] %v2769_v38  ;;  %3305 = vst [vmem:[#allocation10_spill] sm:$0xff] %v2772_v44  ;;  %v2781_v53 = vadd.f32 %v490_v50, %v2717_v35 }
 0x24c   :  { %3306 = vst [vmem:[#allocation11_spill] sm:$0xff] %v2775_v45  ;;  %3307 = vst [vmem:[#allocation12_spill] sm:$0xff] %v2778_v48  ;;  %v2164_v45 = vpop.eup %2163 }
 0x24d   :  { %3308 = vst [vmem:[#allocation13_spill] sm:$0xff] %v2781_v53  ;;  %v2166_v53 = vpop.eup %2165 }
 0x24e   :  { %v421_v28 = vpop.f32.mrb[12].mxu1  ;;  %v494_v31 = vpop.f32.mrb[20].mxu0 }
 0x24f   :  { %v2784_v2 = vadd.f32 %v421_v28, %v2711_v32  ;;  %v2787_v42 = vadd.f32 %v494_v31, %v2713_v33  ;;  %v423_v44 = vpop.f32.mrb[13].mxu1  ;;  %v496_v40 = vpop.f32.mrb[21].mxu0 }
 0x250   :  { %v2790_v38 = vadd.f32 %v423_v44, %v2715_v34  ;;  %v2793_v36 = vadd.f32 %v496_v40, %v2717_v35  ;;  %v425_v49 = vpop.f32.mrb[14].mxu1  ;;  %v498_v50 = vpop.f32.mrb[22].mxu0 }
 0x251   :  { %3309 = vst [vmem:[#allocation14_spill] sm:$0xff] %v2784_v2  ;;  %3310 = vst [vmem:[#allocation15_spill] sm:$0xff] %v2787_v42  ;;  %v2796_v48 = vadd.f32 %v425_v49, %v2711_v32  ;;  %v2799_v28 = vadd.f32 %v498_v50, %v2713_v33  ;;  %v427_v31 = vpop.f32.mrb[15].mxu1  ;;  %v500_v42 = vpop.f32.mrb[23].mxu0 }
 0x252   :  { %3311 = vst [vmem:[#allocation16_spill] sm:$0xff] %v2790_v38  ;;  %3312 = vst [vmem:[#allocation17_spill] sm:$0xff] %v2793_v36  ;;  %v2168_v2 = vpop.eup %2167  ;;  %v2802_v39 = vadd.f32 %v427_v31, %v2715_v34  ;;  %v2805_v44 = vadd.f32 %v500_v42, %v2717_v35  ;;  %v550_v38 = vadd.f32 1.0, %v2166_v53 }
 0x253   :  { %3313 = vst [vmem:[#allocation18_spill] sm:$0xff] %v2796_v48  ;;  %3314 = vst [vmem:[#allocation19_spill] sm:$0xff] %v2799_v28  ;;  %v559_v40 = vmul.f32 %v2168_v2, %v2164_v45  ;;  %v3317_v2 = vmov 0  }
 0x254   :  { %3315 = vst [vmem:[#allocation20_spill] sm:$0xff] %v2802_v39  ;;  %3316 = vst [vmem:[#allocation21_spill] sm:$0xff] %v2805_v44  ;;  %v2170_v36 = vpop.eup %2169  ;;  %2171 = vrcp.f32 %v550_v38 }
 0x255   :  { %v558_v27 = vmul.f32 0.0, %v2170_v36 }
 0x257   :  { %v2807_v54 = vadd.f32 %v559_v40, %v558_v27 }
 0x259   :  { %2173 = vtanh.f32 %v2807_v54 }
 0x25e   :  { %v2172_v32 = vpop.eup %2171 }
 0x263   :  { %v2174_v33 = vpop.eup %2173 }
 0x264   :  { %v2810_v49 = vmul.f32 %v2174_v33, %v2172_v32 }
 0x266   :  { %v567_v34 = vpack.c.bf16 %v2810_v49, %v2810_v49 }
 0x268   :  { %793 = vmatmul.mubr.bf16.vlgmr.msra.gmra.mrb[16].mxu1 %v567_v34  ;;  %834 = vmatmul.mubr.bf16.vlgmr.msra.gmra.mrb[24].mxu0 %v567_v34 }
 0x269   :  { %877 = vmatpush1.bf16.msra.mxu1 %v2526_v58  ;;  %918 = vmatpush1.bf16.msra.mxu0 %v2531_v59 }
 0x26a   :  { %878 = vmatprep.subr.bf16.mxu1 %v2540_v60  ;;  %919 = vmatprep.subr.bf16.mxu0 %v2545_v61 }
 0x26b   :  { %908 = vmatprep.mubr.bf16.mxu1 %v3317_v2  ;;  %949 = vmatprep.mubr.bf16.mxu0 %v3317_v2 }
 0x26d   :  { %879 = vmatpush1.bf16.msra.mxu1 %v2550_v62  ;;  %920 = vmatpush1.bf16.msra.mxu0 %v2555_v63 }
 0x26e   :  { %880 = vmatprep.subr.bf16.mxu1 %v2564_v0  ;;  %921 = vmatprep.subr.bf16.mxu0 %v2569_v1 }
 0x271   :  { %881 = vmatpush1.bf16.msra.mxu1 %v2574_v3  ;;  %922 = vmatpush1.bf16.msra.mxu0 %v2579_v4 }
 0x272   :  { %882 = vmatprep.subr.bf16.mxu1 %v2588_v5  ;;  %923 = vmatprep.subr.bf16.mxu0 %v2593_v6 }
 0x275   :  { %883 = vmatpush1.bf16.msra.mxu1 %v2598_v7  ;;  %924 = vmatpush1.bf16.msra.mxu0 %v2603_v8 }
 0x276   :  { %884 = vmatprep.subr.bf16.mxu1 %v2612_v9  ;;  %925 = vmatprep.subr.bf16.mxu0 %v2617_v10 }
 0x279   :  { %885 = vmatpush1.bf16.msra.mxu1 %v2622_v11  ;;  %926 = vmatpush1.bf16.msra.mxu0 %v2627_v12 }
 0x27a   :  { %886 = vmatprep.subr.bf16.mxu1 %v2636_v13  ;;  %927 = vmatprep.subr.bf16.mxu0 %v2646_v15 }
 0x27d   :  { %887 = vmatpush1.bf16.msra.mxu1 %v2641_v14  ;;  %928 = vmatpush1.bf16.msra.mxu0 %v2651_v16 }
 0x27e   :  { %888 = vmatprep.subr.bf16.mxu1 %v2656_v17  ;;  %929 = vmatprep.subr.bf16.mxu0 %v2663_v18 }
 0x281   :  { %889 = vmatpush1.bf16.msra.mxu1 %v2670_v19  ;;  %930 = vmatpush1.bf16.msra.mxu0 %v2675_v20 }
 0x282   :  { %890 = vmatprep.subr.bf16.mxu1 %v2682_v21  ;;  %931 = vmatprep.subr.bf16.mxu0 %v2687_v22 }
 0x285   :  { %891 = vmatpush1.bf16.msra.mxu1 %v2694_v23  ;;  %932 = vmatpush1.bf16.msra.mxu0 %v2699_v25 }
 0x286   :  { %992 = vmatprep.subr.bf16.mxu1 %v2516_v56  ;;  %1033 = vmatprep.subr.bf16.mxu0 %v2521_v57 }
 0x33b   :  { %v794_v35 = vpop.f32.mrb[16].mxu1  ;;  %v835_v27 = vpop.f32.mrb[24].mxu0 }
 0x33c   :  { %v842_v38 = vadd.f32 %v794_v35, %v2724_v46  ;;  %v844_v45 = vadd.f32 %v835_v27, %v2727_v47  ;;  %v796_v53 = vpop.f32.mrb[17].mxu1  ;;  %v837_v42 = vpop.f32.mrb[25].mxu0 }
 0x33d   :  { %v843_v36 = vadd.f32 %v796_v53, %v2730_v51  ;;  %v845_v50 = vadd.f32 %v837_v42, %v2733_v52  ;;  %v798_v31 = vpop.f32.mrb[18].mxu1  ;;  %v839_v40 = vpop.f32.mrb[26].mxu0 }
 0x33e   :  { %v1861_v32 = vmul.f32 -1.442695, %v842_v38  ;;  %v799_v33 = vpop.f32.mrb[19].mxu1  ;;  %v840_v34 = vpop.f32.mrb[27].mxu0  ;;  %v1863_v39 = vmul.f32 -1.442695, %v844_v45 }
 0x33f   :  { %v1862_v44 = vmul.f32 -1.442695, %v843_v36 }
 0x340   :  { %2175 = vpow2.f32 %v1861_v32 }
 0x341   :  { %2177 = vpow2.f32 %v1862_v44 }
 0x342   :  { %2179 = vtanh.f32 %v845_v50 }
 0x343   :  { %2181 = vpow2.f32 %v1863_v39 }
 0x34a   :  { %v2176_v28 = vpop.eup %2175 }
 0x34b   :  { %v855_v48 = vadd.f32 1.0, %v2176_v28  ;;  %v2178_v46 = vpop.eup %2177 }
 0x34c   :  { %v856_v47 = vadd.f32 1.0, %v2178_v46  ;;  %v2180_v51 = vpop.eup %2179 }
 0x34d   :  { %2183 = vrcp.f32 %v855_v48  ;;  %v2182_v35 = vpop.eup %2181 }
 0x34e   :  { %2185 = vrcp.f32 %v856_v47  ;;  %v857_v38 = vadd.f32 1.0, %v2182_v35 }
 0x350   :  { %2187 = vrcp.f32 %v857_v38 }
 0x357   :  { %v2184_v52 = vpop.eup %2183 }
 0x358   :  { %v866_v27 = vmul.f32 %v2184_v52, %v2180_v51  ;;  %v2186_v53 = vpop.eup %2185 }
 0x359   :  { %v865_v42 = vmul.f32 %v2186_v53, %v2807_v54 }
 0x35a   :  { %v2188_v28 = vpop.eup %2187 }
 0x35b   :  { %v2853_v36 = vadd.f32 %v866_v27, %v865_v42 }
 0x35d   :  { %2189 = vtanh.f32 %v2853_v36 }
 0x367   :  { %v2190_v44 = vpop.eup %2189 }
 0x368   :  { %v2856_v45 = vmul.f32 %v2190_v44, %v2188_v28 }
 0x36a   :  { %v875_v39 = vpack.c.bf16 %v2856_v45, %v2856_v45 }
 0x36c   :  { %909 = vmatmul.mubr.bf16.vlgmr.msra.gmra.mrb[20].mxu1 %v875_v39  ;;  %950 = vmatmul.mubr.bf16.vlgmr.msra.gmra.mrb[28].mxu0 %v875_v39 }
 0x36d   :  { %993 = vmatpush1.bf16.msra.mxu1 %v2526_v58  ;;  %1034 = vmatpush1.bf16.msra.mxu0 %v2531_v59 }
 0x36e   :  { %994 = vmatprep.subr.bf16.mxu1 %v2540_v60  ;;  %1035 = vmatprep.subr.bf16.mxu0 %v2545_v61 }
 0x36f   :  { %1024 = vmatprep.mubr.bf16.mxu1 %v3317_v2  ;;  %1065 = vmatprep.mubr.bf16.mxu0 %v3317_v2 }
 0x371   :  { %995 = vmatpush1.bf16.msra.mxu1 %v2550_v62  ;;  %1036 = vmatpush1.bf16.msra.mxu0 %v2555_v63 }
 0x372   :  { %996 = vmatprep.subr.bf16.mxu1 %v2564_v0  ;;  %1037 = vmatprep.subr.bf16.mxu0 %v2569_v1 }
 0x375   :  { %997 = vmatpush1.bf16.msra.mxu1 %v2574_v3  ;;  %1038 = vmatpush1.bf16.msra.mxu0 %v2579_v4 }
 0x376   :  { %998 = vmatprep.subr.bf16.mxu1 %v2588_v5  ;;  %1039 = vmatprep.subr.bf16.mxu0 %v2593_v6 }
 0x379   :  { %999 = vmatpush1.bf16.msra.mxu1 %v2598_v7  ;;  %1040 = vmatpush1.bf16.msra.mxu0 %v2603_v8 }
 0x37a   :  { %1000 = vmatprep.subr.bf16.mxu1 %v2612_v9  ;;  %1041 = vmatprep.subr.bf16.mxu0 %v2617_v10 }
 0x37d   :  { %1001 = vmatpush1.bf16.msra.mxu1 %v2622_v11  ;;  %1042 = vmatpush1.bf16.msra.mxu0 %v2627_v12 }
 0x37e   :  { %1002 = vmatprep.subr.bf16.mxu1 %v2636_v13  ;;  %1043 = vmatprep.subr.bf16.mxu0 %v2646_v15 }
 0x381   :  { %1003 = vmatpush1.bf16.msra.mxu1 %v2641_v14  ;;  %1044 = vmatpush1.bf16.msra.mxu0 %v2651_v16 }
 0x382   :  { %1004 = vmatprep.subr.bf16.mxu1 %v2656_v17  ;;  %1045 = vmatprep.subr.bf16.mxu0 %v2663_v18 }
 0x385   :  { %1005 = vmatpush1.bf16.msra.mxu1 %v2670_v19  ;;  %1046 = vmatpush1.bf16.msra.mxu0 %v2675_v20 }
 0x386   :  { %1006 = vmatprep.subr.bf16.mxu1 %v2682_v21  ;;  %1047 = vmatprep.subr.bf16.mxu0 %v2687_v22 }
 0x389   :  { %1007 = vmatpush1.bf16.msra.mxu1 %v2694_v23  ;;  %1048 = vmatpush1.bf16.msra.mxu0 %v2699_v25 }
 0x38a   :  { %1108 = vmatprep.subr.bf16.mxu1 %v2516_v56  ;;  %1149 = vmatprep.subr.bf16.mxu0 %v2521_v57 }
 0x43f   :  { %v910_v54 = vpop.f32.mrb[20].mxu1  ;;  %v951_v48 = vpop.f32.mrb[28].mxu0 }
 0x440   :  { %v958_v50 = vadd.f32 %v910_v54, %v2736_v55  ;;  %v960_v31 = vadd.f32 %v951_v48, %v2739_v26  ;;  %v912_v40 = vpop.f32.mrb[21].mxu1  ;;  %v953_v32 = vpop.f32.mrb[29].mxu0 }
 0x441   :  { %v959_v33 = vadd.f32 %v912_v40, %v2742_v29  ;;  %v961_v34 = vadd.f32 %v953_v32, %v2745_v30  ;;  %v914_v46 = vpop.f32.mrb[22].mxu1  ;;  %v955_v47 = vpop.f32.mrb[30].mxu0  ;;  %v870_v32 = vmax.f32 %v2810_v49, %v2856_v45 }
 0x442   :  { %v1864_v51 = vmul.f32 -1.442695, %v958_v50  ;;  %v915_v35 = vpop.f32.mrb[23].mxu1  ;;  %v956_v52 = vpop.f32.mrb[31].mxu0  ;;  %v1866_v53 = vmul.f32 -1.442695, %v960_v31 }
 0x443   :  { %v1865_v27 = vmul.f32 -1.442695, %v959_v33 }
 0x444   :  { %2191 = vpow2.f32 %v1864_v51 }
 0x445   :  { %2193 = vpow2.f32 %v1865_v27 }
 0x446   :  { %2195 = vtanh.f32 %v961_v34 }
 0x447   :  { %2197 = vpow2.f32 %v1866_v53 }
 0x44e   :  { %v2192_v38 = vpop.eup %2191 }
 0x44f   :  { %v971_v42 = vadd.f32 1.0, %v2192_v38  ;;  %v2194_v55 = vpop.eup %2193 }
 0x450   :  { %v972_v26 = vadd.f32 1.0, %v2194_v55  ;;  %v2196_v29 = vpop.eup %2195 }
 0x451   :  { %2199 = vrcp.f32 %v971_v42  ;;  %v2198_v28 = vpop.eup %2197 }
 0x452   :  { %2201 = vrcp.f32 %v972_v26  ;;  %v973_v54 = vadd.f32 1.0, %v2198_v28 }
 0x454   :  { %2203 = vrcp.f32 %v973_v54 }
 0x45b   :  { %v2200_v30 = vpop.eup %2199 }
 0x45c   :  { %v982_v44 = vmul.f32 %v2200_v30, %v2196_v29  ;;  %v2202_v39 = vpop.eup %2201 }
 0x45d   :  { %v981_v48 = vmul.f32 %v2202_v39, %v2853_v36 }
 0x45e   :  { %v2204_v31 = vpop.eup %2203 }
 0x45f   :  { %v2899_v50 = vadd.f32 %v982_v44, %v981_v48 }
 0x461   :  { %2205 = vtanh.f32 %v2899_v50 }
 0x46b   :  { %v2206_v40 = vpop.eup %2205 }
 0x46c   :  { %v985_v33 = vmul.f32 %v2206_v40, %v2204_v31 }
 0x46e   :  { %v2904_v34 = vmax.f32 %v870_v32, %v985_v33  ;;  %v991_v46 = vpack.c.bf16 %v985_v33, %v985_v33 }
 0x470   :  { %1025 = vmatmul.mubr.bf16.vlgmr.msra.gmra.mrb[24].mxu1 %v991_v46  ;;  %1066 = vmatmul.mubr.bf16.vlgmr.msra.gmra.mrb[32].mxu0 %v991_v46 }
 0x471   :  { %1109 = vmatpush1.bf16.msra.mxu1 %v2526_v58  ;;  %1150 = vmatpush1.bf16.msra.mxu0 %v2531_v59 }
 0x472   :  { %1110 = vmatprep.subr.bf16.mxu1 %v2540_v60  ;;  %1151 = vmatprep.subr.bf16.mxu0 %v2545_v61 }
 0x473   :  { %1140 = vmatprep.mubr.bf16.mxu1 %v3317_v2  ;;  %1181 = vmatprep.mubr.bf16.mxu0 %v3317_v2 }
 0x475   :  { %1111 = vmatpush1.bf16.msra.mxu1 %v2550_v62  ;;  %1152 = vmatpush1.bf16.msra.mxu0 %v2555_v63 }
 0x476   :  { %1112 = vmatprep.subr.bf16.mxu1 %v2564_v0  ;;  %1153 = vmatprep.subr.bf16.mxu0 %v2569_v1 }
 0x479   :  { %1113 = vmatpush1.bf16.msra.mxu1 %v2574_v3  ;;  %1154 = vmatpush1.bf16.msra.mxu0 %v2579_v4 }
 0x47a   :  { %1114 = vmatprep.subr.bf16.mxu1 %v2588_v5  ;;  %1155 = vmatprep.subr.bf16.mxu0 %v2593_v6 }
 0x47d   :  { %1115 = vmatpush1.bf16.msra.mxu1 %v2598_v7  ;;  %1156 = vmatpush1.bf16.msra.mxu0 %v2603_v8 }
 0x47e   :  { %1116 = vmatprep.subr.bf16.mxu1 %v2612_v9  ;;  %1157 = vmatprep.subr.bf16.mxu0 %v2617_v10 }
 0x481   :  { %1117 = vmatpush1.bf16.msra.mxu1 %v2622_v11  ;;  %1158 = vmatpush1.bf16.msra.mxu0 %v2627_v12 }
 0x482   :  { %1118 = vmatprep.subr.bf16.mxu1 %v2636_v13  ;;  %1159 = vmatprep.subr.bf16.mxu0 %v2646_v15 }
 0x485   :  { %1119 = vmatpush1.bf16.msra.mxu1 %v2641_v14  ;;  %1160 = vmatpush1.bf16.msra.mxu0 %v2651_v16 }
 0x486   :  { %1120 = vmatprep.subr.bf16.mxu1 %v2656_v17  ;;  %1161 = vmatprep.subr.bf16.mxu0 %v2663_v18 }
 0x489   :  { %1121 = vmatpush1.bf16.msra.mxu1 %v2670_v19  ;;  %1162 = vmatpush1.bf16.msra.mxu0 %v2675_v20 }
 0x48a   :  { %1122 = vmatprep.subr.bf16.mxu1 %v2682_v21  ;;  %1163 = vmatprep.subr.bf16.mxu0 %v2687_v22 }
 0x48d   :  { %1123 = vmatpush1.bf16.msra.mxu1 %v2694_v23  ;;  %1164 = vmatpush1.bf16.msra.mxu0 %v2699_v25 }
 0x48e   :  { %1224 = vmatprep.subr.bf16.mxu1 %v2516_v56  ;;  %1265 = vmatprep.subr.bf16.mxu0 %v2521_v57 }
 0x543   :  { %v1026_v49 = vpop.f32.mrb[24].mxu1  ;;  %v1067_v36 = vpop.f32.mrb[32].mxu0 }
 0x544   :  { %v1074_v45 = vadd.f32 %v1026_v49, %v2748_v37  ;;  %v1076_v47 = vadd.f32 %v1067_v36, %v2751_v24  ;;  %v1028_v51 = vpop.f32.mrb[25].mxu1  ;;  %v1069_v35 = vpop.f32.mrb[33].mxu0 }
 0x545   :  { %v1075_v52 = vadd.f32 %v1028_v51, %v2754_v41  ;;  %v1077_v27 = vadd.f32 %v1069_v35, %v2757_v43  ;;  %v1030_v53 = vpop.f32.mrb[26].mxu1  ;;  %v1071_v38 = vpop.f32.mrb[34].mxu0  ;;  %v3318_v51 = vld [vmem:[#allocation6_spill] sm:$0xff] }
 0x546   :  { %v1867_v42 = vmul.f32 -1.442695, %v1074_v45  ;;  %v1031_v55 = vpop.f32.mrb[27].mxu1  ;;  %v1072_v26 = vpop.f32.mrb[35].mxu0  ;;  %v1869_v28 = vmul.f32 -1.442695, %v1076_v47 }
 0x547   :  { %v1868_v29 = vmul.f32 -1.442695, %v1075_v52  ;;  %v3319_v52 = vld [vmem:[#allocation7_spill] sm:$0xff]  ;;  %v3321_v26 = vld [vmem:[#allocation9_spill] sm:$0xff] }
 0x548   :  { %2207 = vpow2.f32 %v1867_v42  ;;  %v3320_v42 = vld [vmem:[#allocation8_spill] sm:$0xff] }
 0x549   :  { %2209 = vpow2.f32 %v1868_v29 }
 0x54a   :  { %2211 = vtanh.f32 %v1077_v27 }
 0x54b   :  { %2213 = vpow2.f32 %v1869_v28 }
 0x552   :  { %v2208_v30 = vpop.eup %2207 }
 0x553   :  { %v1087_v44 = vadd.f32 1.0, %v2208_v30  ;;  %v2210_v37 = vpop.eup %2209 }
 0x554   :  { %v1088_v24 = vadd.f32 1.0, %v2210_v37  ;;  %v2212_v41 = vpop.eup %2211 }
 0x555   :  { %2215 = vrcp.f32 %v1087_v44  ;;  %v2214_v39 = vpop.eup %2213 }
 0x556   :  { %2217 = vrcp.f32 %v1088_v24  ;;  %v1089_v31 = vadd.f32 1.0, %v2214_v39 }
 0x558   :  { %2219 = vrcp.f32 %v1089_v31 }
 0x55f   :  { %v2216_v43 = vpop.eup %2215 }
 0x560   :  { %v1098_v54 = vmul.f32 %v2216_v43, %v2212_v41  ;;  %v2218_v48 = vpop.eup %2217 }
 0x561   :  { %v1097_v40 = vmul.f32 %v2218_v48, %v2899_v50 }
 0x562   :  { %v2220_v33 = vpop.eup %2219 }
 0x563   :  { %v2945_v32 = vadd.f32 %v1098_v54, %v1097_v40 }
 0x565   :  { %2221 = vtanh.f32 %v2945_v32 }
 0x56f   :  { %v2222_v46 = vpop.eup %2221 }
 0x570   :  { %v2948_v49 = vmul.f32 %v2222_v46, %v2220_v33 }
 0x572   :  { %v1102_v36 = vmax.f32 %v2904_v34, %v2948_v49  ;;  %v1107_v45 = vpack.c.bf16 %v2948_v49, %v2948_v49 }
 0x574   :  { %1141 = vmatmul.mubr.bf16.vlgmr.msra.gmra.mrb[28].mxu1 %v1107_v45  ;;  %1182 = vmatmul.mubr.bf16.vlgmr.msra.gmra.mrb[36].mxu0 %v1107_v45 }
 0x575   :  { %1225 = vmatpush1.bf16.msra.mxu1 %v2526_v58  ;;  %1266 = vmatpush1.bf16.msra.mxu0 %v2531_v59 }
 0x576   :  { %1226 = vmatprep.subr.bf16.mxu1 %v2540_v60  ;;  %1267 = vmatprep.subr.bf16.mxu0 %v2545_v61 }
 0x577   :  { %1256 = vmatprep.mubr.bf16.mxu1 %v3317_v2  ;;  %1297 = vmatprep.mubr.bf16.mxu0 %v3317_v2 }
 0x579   :  { %1227 = vmatpush1.bf16.msra.mxu1 %v2550_v62  ;;  %1268 = vmatpush1.bf16.msra.mxu0 %v2555_v63 }
 0x57a   :  { %1228 = vmatprep.subr.bf16.mxu1 %v2564_v0  ;;  %1269 = vmatprep.subr.bf16.mxu0 %v2569_v1 }
 0x57d   :  { %1229 = vmatpush1.bf16.msra.mxu1 %v2574_v3  ;;  %1270 = vmatpush1.bf16.msra.mxu0 %v2579_v4 }
 0x57e   :  { %1230 = vmatprep.subr.bf16.mxu1 %v2588_v5  ;;  %1271 = vmatprep.subr.bf16.mxu0 %v2593_v6 }
 0x581   :  { %1231 = vmatpush1.bf16.msra.mxu1 %v2598_v7  ;;  %1272 = vmatpush1.bf16.msra.mxu0 %v2603_v8 }
 0x582   :  { %1232 = vmatprep.subr.bf16.mxu1 %v2612_v9  ;;  %1273 = vmatprep.subr.bf16.mxu0 %v2617_v10 }
 0x585   :  { %1233 = vmatpush1.bf16.msra.mxu1 %v2622_v11  ;;  %1274 = vmatpush1.bf16.msra.mxu0 %v2627_v12 }
 0x586   :  { %1234 = vmatprep.subr.bf16.mxu1 %v2636_v13  ;;  %1275 = vmatprep.subr.bf16.mxu0 %v2646_v15 }
 0x589   :  { %1235 = vmatpush1.bf16.msra.mxu1 %v2641_v14  ;;  %1276 = vmatpush1.bf16.msra.mxu0 %v2651_v16 }
 0x58a   :  { %1236 = vmatprep.subr.bf16.mxu1 %v2656_v17  ;;  %1277 = vmatprep.subr.bf16.mxu0 %v2663_v18 }
 0x58d   :  { %1237 = vmatpush1.bf16.msra.mxu1 %v2670_v19  ;;  %1278 = vmatpush1.bf16.msra.mxu0 %v2675_v20 }
 0x58e   :  { %1238 = vmatprep.subr.bf16.mxu1 %v2682_v21  ;;  %1279 = vmatprep.subr.bf16.mxu0 %v2687_v22 }
 0x591   :  { %1239 = vmatpush1.bf16.msra.mxu1 %v2694_v23  ;;  %1280 = vmatpush1.bf16.msra.mxu0 %v2699_v25 }
 0x592   :  { %1340 = vmatprep.subr.bf16.mxu1 %v2516_v56  ;;  %1381 = vmatprep.subr.bf16.mxu0 %v2521_v57 }
 0x647   :  { %v1142_v50 = vpop.f32.mrb[28].mxu1  ;;  %v1183_v47 = vpop.f32.mrb[36].mxu0 }
 0x648   :  { %v1190_v35 = vadd.f32 %v1142_v50, %v3318_v51  ;;  %v1192_v27 = vadd.f32 %v1183_v47, %v3319_v52  ;;  %v1144_v53 = vpop.f32.mrb[29].mxu1  ;;  %v1185_v38 = vpop.f32.mrb[37].mxu0 }
 0x649   :  { %v1191_v55 = vadd.f32 %v1144_v53, %v3320_v42  ;;  %v1193_v29 = vadd.f32 %v1185_v38, %v3321_v26  ;;  %v1146_v28 = vpop.f32.mrb[30].mxu1  ;;  %v1187_v30 = vpop.f32.mrb[38].mxu0  ;;  %v2292_v26 = vld [vmem:[%s3293_s3 + $0x8] ss:$16 sps:$4 sm:$0xff]  }
 0x64a   :  { %v1870_v44 = vmul.f32 -1.442695, %v1190_v35  ;;  %v1147_v37 = vpop.f32.mrb[31].mxu1  ;;  %v1188_v24 = vpop.f32.mrb[39].mxu0  ;;  %v1872_v39 = vmul.f32 -1.442695, %v1192_v27 }
 0x64b   :  { %v1871_v41 = vmul.f32 -1.442695, %v1191_v55  ;;  %v2291_v55 = vld [vmem:[%s3293_s3] ss:$16 sps:$4 sm:$0xff]   ;;  %v2294_v28 = vld [vmem:[%s3293_s3 + $0x2c] ss:$16 sps:$4 sm:$0xff]  }
 0x64c   :  { %2223 = vpow2.f32 %v1870_v44  ;;  %v2295_v30 = vld [vmem:[%s3293_s3 + $0x20] ss:$16 sps:$4 sm:$0xff]   ;;  %v2296_v44 = vld [vmem:[%s3293_s3 + $0x28] ss:$16 sps:$4 sm:$0xff]   ;;  %v2297_v37 = vld [vmem:[%s3293_s3 + $0x44] ss:$16 sps:$4 sm:$0xff]  }
 0x64d   :  { %2225 = vpow2.f32 %v1871_v41  ;;  %v2298_v24 = vld [vmem:[%s3293_s3 + $0x4c] ss:$16 sps:$4 sm:$0xff]   ;;  %v2300_v41 = vld [vmem:[%s3293_s3 + $0x48] ss:$16 sps:$4 sm:$0xff]  }
 0x64e   :  { %2227 = vtanh.f32 %v1193_v29  ;;  %v2293_v29 = vld [vmem:[%s3293_s3 + $0x24] ss:$16 sps:$4 sm:$0xff]  }
 0x64f   :  { %2229 = vpow2.f32 %v1872_v39  ;;  %v2301_v39 = vld [vmem:[%s3293_s3 + $0x64] ss:$16 sps:$4 sm:$0xff]  }
 0x656   :  { %v2224_v43 = vpop.eup %2223 }
 0x657   :  { %v1203_v54 = vadd.f32 1.0, %v2224_v43  ;;  %v2226_v48 = vpop.eup %2225  ;;  %v2302_v43 = vld [vmem:[%s3293_s3 + $0x6c] ss:$16 sps:$4 sm:$0xff]  }
 0x658   :  { %v1204_v31 = vadd.f32 1.0, %v2226_v48  ;;  %v2228_v40 = vpop.eup %2227  ;;  %v2304_v48 = vld [vmem:[%s3293_s3 + $0x68] ss:$16 sps:$4 sm:$0xff]  }
 0x659   :  { %2231 = vrcp.f32 %v1203_v54  ;;  %v2230_v33 = vpop.eup %2229  ;;  %v2303_v54 = vld [vmem:[%s3293_s3 + $0x60] ss:$16 sps:$4 sm:$0xff]  }
 0x65a   :  { %2233 = vrcp.f32 %v1204_v31  ;;  %v1205_v47 = vadd.f32 1.0, %v2230_v33  ;;  %v2305_v31 = vld [vmem:[%s3293_s3 + $0x84] ss:$16 sps:$4 sm:$0xff]   ;;  %v2307_v33 = vld [vmem:[%s3293_s3 + $0x80] ss:$16 sps:$4 sm:$0xff]  }
 0x65c   :  { %2235 = vrcp.f32 %v1205_v47  ;;  %v2311_v47 = vld [vmem:[%s3293_s3 + $0xa0] ss:$16 sps:$4 sm:$0xff]  }
 0x663   :  { %v2232_v46 = vpop.eup %2231 }
 0x664   :  { %v1214_v45 = vmul.f32 %v2232_v46, %v2228_v40  ;;  %v2234_v50 = vpop.eup %2233  ;;  %v2306_v40 = vld [vmem:[%s3293_s3 + $0x8c] ss:$16 sps:$4 sm:$0xff]   ;;  %v2308_v46 = vld [vmem:[%s3293_s3 + $0x88] ss:$16 sps:$4 sm:$0xff]  }
 0x665   :  { %v1213_v51 = vmul.f32 %v2234_v50, %v2945_v32  ;;  %v2310_v50 = vld [vmem:[%s3293_s3 + $0xac] ss:$16 sps:$4 sm:$0xff]  }
 0x666   :  { %v2236_v52 = vpop.eup %2235 }
 0x667   :  { %v2993_v35 = vadd.f32 %v1214_v45, %v1213_v51  ;;  %v2309_v45 = vld [vmem:[%s3293_s3 + $0xa4] ss:$16 sps:$4 sm:$0xff]   ;;  %v2312_v51 = vld [vmem:[%s3293_s3 + $0xa8] ss:$16 sps:$4 sm:$0xff]  }
 0x669   :  { %2237 = vtanh.f32 %v2993_v35 }
 0x673   :  { %v2238_v27 = vpop.eup %2237 }
 0x674   :  { %v1217_v53 = vmul.f32 %v2238_v27, %v2236_v52  ;;  %v2314_v52 = vld [vmem:[%s3293_s3 + $0xcc] ss:$16 sps:$4 sm:$0xff]   ;;  %v2315_v27 = vld [vmem:[%s3293_s3 + $0xc0] ss:$16 sps:$4 sm:$0xff]  }
 0x676   :  { %v2999_v38 = vmax.f32 %v1102_v36, %v1217_v53  ;;  %v1223_v42 = vpack.c.bf16 %v1217_v53, %v1217_v53  ;;  %v2316_v53 = vld [vmem:[%s3293_s3 + $0xc8] ss:$16 sps:$4 sm:$0xff]  }
 0x678   :  { %1257 = vmatmul.mubr.bf16.vlgmr.msra.gmra.mrb[32].mxu1 %v1223_v42  ;;  %1298 = vmatmul.mubr.bf16.vlgmr.msra.gmra.mrb[40].mxu0 %v1223_v42  ;;  %v2317_v42 = vld [vmem:[%s3293_s3 + $0xe4] ss:$16 sps:$4 sm:$0xff]  }
 0x679   :  { %1341 = vmatpush1.bf16.msra.mxu1 %v2526_v58  ;;  %1382 = vmatpush1.bf16.msra.mxu0 %v2531_v59 }
 0x67a   :  { %1342 = vmatprep.subr.bf16.mxu1 %v2540_v60  ;;  %1383 = vmatprep.subr.bf16.mxu0 %v2545_v61  ;;  %v3322_v60 = vld [vmem:[#allocation10_spill] sm:$0xff] }
 0x67b   :  { %1372 = vmatprep.mubr.bf16.mxu1 %v3317_v2  ;;  %1413 = vmatprep.mubr.bf16.mxu0 %v3317_v2 }
 0x67d   :  { %1343 = vmatpush1.bf16.msra.mxu1 %v2550_v62  ;;  %1384 = vmatpush1.bf16.msra.mxu0 %v2555_v63  ;;  %v3323_v62 = vld [vmem:[#allocation11_spill] sm:$0xff] }
 0x67e   :  { %1344 = vmatprep.subr.bf16.mxu1 %v2564_v0  ;;  %1385 = vmatprep.subr.bf16.mxu0 %v2569_v1 }
 0x681   :  { %1345 = vmatpush1.bf16.msra.mxu1 %v2574_v3  ;;  %1386 = vmatpush1.bf16.msra.mxu0 %v2579_v4  ;;  %v3324_v3 = vld [vmem:[#allocation12_spill] sm:$0xff] }
 0x682   :  { %1346 = vmatprep.subr.bf16.mxu1 %v2588_v5  ;;  %1387 = vmatprep.subr.bf16.mxu0 %v2593_v6  ;;  %v3325_v5 = vld [vmem:[#allocation13_spill] sm:$0xff] }
 0x685   :  { %1347 = vmatpush1.bf16.msra.mxu1 %v2598_v7  ;;  %1388 = vmatpush1.bf16.msra.mxu0 %v2603_v8 }
 0x686   :  { %1348 = vmatprep.subr.bf16.mxu1 %v2612_v9  ;;  %1389 = vmatprep.subr.bf16.mxu0 %v2617_v10 }
 0x689   :  { %1349 = vmatpush1.bf16.msra.mxu1 %v2622_v11  ;;  %1390 = vmatpush1.bf16.msra.mxu0 %v2627_v12 }
 0x68a   :  { %1350 = vmatprep.subr.bf16.mxu1 %v2636_v13  ;;  %1391 = vmatprep.subr.bf16.mxu0 %v2646_v15 }
 0x68d   :  { %1351 = vmatpush1.bf16.msra.mxu1 %v2641_v14  ;;  %1392 = vmatpush1.bf16.msra.mxu0 %v2651_v16 }
 0x68e   :  { %1352 = vmatprep.subr.bf16.mxu1 %v2656_v17  ;;  %1393 = vmatprep.subr.bf16.mxu0 %v2663_v18 }
 0x691   :  { %1353 = vmatpush1.bf16.msra.mxu1 %v2670_v19  ;;  %1394 = vmatpush1.bf16.msra.mxu0 %v2675_v20 }
 0x692   :  { %1354 = vmatprep.subr.bf16.mxu1 %v2682_v21  ;;  %1395 = vmatprep.subr.bf16.mxu0 %v2687_v22 }
 0x695   :  { %1355 = vmatpush1.bf16.msra.mxu1 %v2694_v23  ;;  %1396 = vmatpush1.bf16.msra.mxu0 %v2699_v25 }
 0x696   :  { %1456 = vmatprep.subr.bf16.mxu1 %v2516_v56  ;;  %1497 = vmatprep.subr.bf16.mxu0 %v2521_v57 }
 0x74b   :  { %v1258_v58 = vpop.f32.mrb[32].mxu1  ;;  %v1299_v59 = vpop.f32.mrb[40].mxu0 }
 0x74c   :  { %v1306_v61 = vadd.f32 %v1258_v58, %v3322_v60  ;;  %v1308_v63 = vadd.f32 %v1299_v59, %v3323_v62  ;;  %v1260_v0 = vpop.f32.mrb[33].mxu1  ;;  %v1301_v1 = vpop.f32.mrb[41].mxu0  ;;  %v2318_v58 = vld [vmem:[%s3293_s3 + $0xec] ss:$16 sps:$4 sm:$0xff]   ;;  %v2319_v59 = vld [vmem:[%s3293_s3 + $0xe0] ss:$16 sps:$4 sm:$0xff]  }
 0x74d   :  { %v1307_v4 = vadd.f32 %v1260_v0, %v3324_v3  ;;  %v1309_v6 = vadd.f32 %v1301_v1, %v3325_v5  ;;  %v1262_v7 = vpop.f32.mrb[34].mxu1  ;;  %v1303_v8 = vpop.f32.mrb[42].mxu0  ;;  %v2320_v60 = vld [vmem:[%s3293_s3 + $0xe8] ss:$16 sps:$4 sm:$0xff]  }
 0x74e   :  { %v1873_v9 = vmul.f32 -1.442695, %v1306_v61  ;;  %v1263_v10 = vpop.f32.mrb[35].mxu1  ;;  %v1304_v11 = vpop.f32.mrb[43].mxu0  ;;  %v1875_v57 = vmul.f32 -1.442695, %v1308_v63 }
 0x74f   :  { %v1874_v56 = vmul.f32 -1.442695, %v1307_v4  ;;  %v3326_v63 = vld [vmem:[#allocation14_spill] sm:$0xff]  ;;  %v3327_v1 = vld [vmem:[#allocation15_spill] sm:$0xff]  ;;  %v3329_v8 = vld [vmem:[#allocation17_spill] sm:$0xff] }
 0x750   :  { %2239 = vpow2.f32 %v1873_v9 }
 0x751   :  { %2241 = vpow2.f32 %v1874_v56 }
 0x752   :  { %2243 = vtanh.f32 %v1309_v6  ;;  %v3328_v6 = vld [vmem:[#allocation16_spill] sm:$0xff] }
 0x753   :  { %2245 = vpow2.f32 %v1875_v57 }
 0x75a   :  { %v2240_v12 = vpop.eup %2239 }
 0x75b   :  { %v1319_v13 = vadd.f32 1.0, %v2240_v12  ;;  %v2242_v14 = vpop.eup %2241 }
 0x75c   :  { %v1320_v15 = vadd.f32 1.0, %v2242_v14  ;;  %v2244_v16 = vpop.eup %2243 }
 0x75d   :  { %2247 = vrcp.f32 %v1319_v13  ;;  %v2246_v17 = vpop.eup %2245 }
 0x75e   :  { %2249 = vrcp.f32 %v1320_v15  ;;  %v1321_v21 = vadd.f32 1.0, %v2246_v17 }
 0x760   :  { %2251 = vrcp.f32 %v1321_v21 }
 0x767   :  { %v2248_v18 = vpop.eup %2247 }
 0x768   :  { %v1330_v19 = vmul.f32 %v2248_v18, %v2244_v16  ;;  %v2250_v20 = vpop.eup %2249 }
 0x769   :  { %v1329_v22 = vmul.f32 %v2250_v20, %v2993_v35  ;;  %v2313_v35 = vld [vmem:[%s3293_s3 + $0xc4] ss:$16 sps:$4 sm:$0xff]  }
 0x76a   :  { %v2252_v25 = vpop.eup %2251 }
 0x76b   :  { %v3040_v23 = vadd.f32 %v1330_v19, %v1329_v22 }
 0x76d   :  { %2253 = vtanh.f32 %v3040_v23 }
 0x777   :  { %v2254_v34 = vpop.eup %2253 }
 0x778   :  { %v3043_v32 = vmul.f32 %v2254_v34, %v2252_v25 }
 0x77a   :  { %v1339_v49 = vpack.c.bf16 %v3043_v32, %v3043_v32  ;;  %v1334_v36 = vmax.f32 %v2999_v38, %v3043_v32  ;;  %v1583_v38 = vld [vmem:[%s3296_s6] sm:$0xff]  ;;  %v1584_v32 = vld [vmem:[%s3296_s6 + $0x8] sm:$0xff] }
 0x77c   :  { %1373 = vmatmul.mubr.bf16.vlgmr.msra.gmra.mrb[36].mxu1 %v1339_v49  ;;  %1414 = vmatmul.mubr.bf16.vlgmr.msra.gmra.mrb[44].mxu0 %v1339_v49 }
 0x77d   :  { %1457 = vmatpush1.bf16.msra.mxu1 %v2291_v55  ;;  %1498 = vmatpush1.bf16.msra.mxu0 %v2292_v26 }
 0x77e   :  { %1458 = vmatprep.subr.bf16.mxu1 %v2293_v29  ;;  %1499 = vmatprep.subr.bf16.mxu0 %v2294_v28 }
 0x77f   :  { %1488 = vmatprep.mubr.bf16.mxu1 %v3317_v2  ;;  %1529 = vmatprep.mubr.bf16.mxu0 %v3317_v2  ;;  %v2299_v2 = vld [vmem:[%s3293_s3 + $0x40] ss:$16 sps:$4 sm:$0xff]  }
 0x781   :  { %1459 = vmatpush1.bf16.msra.mxu1 %v2295_v30  ;;  %1500 = vmatpush1.bf16.msra.mxu0 %v2296_v44 }
 0x782   :  { %1460 = vmatprep.subr.bf16.mxu1 %v2297_v37  ;;  %1501 = vmatprep.subr.bf16.mxu0 %v2298_v24  ;;  %v1568_v37 = vld [vmem:[%s3295_s5 + $0x8] sm:$0xff] }
 0x785   :  { %1461 = vmatpush1.bf16.msra.mxu1 %v2299_v2  ;;  %1502 = vmatpush1.bf16.msra.mxu0 %v2300_v41  ;;  %v2347_v2 = vmov 0.0|0.0   ;;  %v1569_v41 = vld [vmem:[%s3295_s5 + $0x10] sm:$0xff] }
 0x786   :  { %1462 = vmatprep.subr.bf16.mxu1 %v2301_v39  ;;  %1503 = vmatprep.subr.bf16.mxu0 %v2302_v43  ;;  %v1570_v39 = vld [vmem:[%s3295_s5 + $0x18] sm:$0xff] }
 0x787   :  { %v2051_v43 = vpack.c.bf16 %v1570_v39, %v1569_v41 }
 0x789   :  { %1463 = vmatpush1.bf16.msra.mxu1 %v2303_v54  ;;  %1504 = vmatpush1.bf16.msra.mxu0 %v2304_v48  ;;  %v1585_v54 = vld [vmem:[%s3296_s6 + $0x10] sm:$0xff]  ;;  %v1586_v48 = vld [vmem:[%s3296_s6 + $0x18] sm:$0xff] }
 0x78a   :  { %1464 = vmatprep.subr.bf16.mxu1 %v2305_v31  ;;  %1505 = vmatprep.subr.bf16.mxu0 %v2306_v40  ;;  %v2027_v31 = vpack.c.bf16 %v1586_v48, %v1585_v54  ;;  %v1571_v40 = vld [vmem:[%s3295_s5 + $0x20] sm:$0xff] }
 0x78d   :  { %1465 = vmatpush1.bf16.msra.mxu1 %v2307_v33  ;;  %1506 = vmatpush1.bf16.msra.mxu0 %v2308_v46  ;;  %v1572_v33 = vld [vmem:[%s3295_s5 + $0x28] sm:$0xff] }
 0x78e   :  { %1466 = vmatprep.subr.bf16.mxu1 %v2309_v45  ;;  %1507 = vmatprep.subr.bf16.mxu0 %v2310_v50  ;;  %v2054_v46 = vpack.c.bf16 %v1572_v33, %v1571_v40  ;;  %v1587_v45 = vld [vmem:[%s3296_s6 + $0x20] sm:$0xff]  ;;  %v1588_v50 = vld [vmem:[%s3296_s6 + $0x28] sm:$0xff] }
 0x791   :  { %1467 = vmatpush1.bf16.msra.mxu1 %v2311_v47  ;;  %1508 = vmatpush1.bf16.msra.mxu0 %v2312_v51  ;;  %v2030_v47 = vpack.c.bf16 %v1588_v50, %v1587_v45  ;;  %v1573_v51 = vld [vmem:[%s3295_s5 + $0x30] sm:$0xff] }
 0x792   :  { %1468 = vmatprep.subr.bf16.mxu1 %v2313_v35  ;;  %1509 = vmatprep.subr.bf16.mxu0 %v2314_v52  ;;  %v1574_v35 = vld [vmem:[%s3295_s5 + $0x38] sm:$0xff] }
 0x793   :  { %v2057_v52 = vpack.c.bf16 %v1574_v35, %v1573_v51 }
 0x795   :  { %1469 = vmatpush1.bf16.msra.mxu1 %v2315_v27  ;;  %1510 = vmatpush1.bf16.msra.mxu0 %v2316_v53  ;;  %v1589_v27 = vld [vmem:[%s3296_s6 + $0x30] sm:$0xff]  ;;  %v1590_v53 = vld [vmem:[%s3296_s6 + $0x38] sm:$0xff] }
 0x796   :  { %1470 = vmatprep.subr.bf16.mxu1 %v2317_v42  ;;  %1511 = vmatprep.subr.bf16.mxu0 %v2318_v58  ;;  %v2033_v42 = vpack.c.bf16 %v1590_v53, %v1589_v27  ;;  %v1575_v58 = vld [vmem:[%s3295_s5 + $0x40] sm:$0xff] }
 0x799   :  { %1471 = vmatpush1.bf16.msra.mxu1 %v2319_v59  ;;  %1512 = vmatpush1.bf16.msra.mxu0 %v2320_v60  ;;  %v1576_v59 = vld [vmem:[%s3295_s5 + $0x48] sm:$0xff] }
 0x79a   :  { %2047 = vmatprep.subr.bf16.mxu0 %v2347_v2  ;;  %2023 = vmatprep.subr.bf16.mxu1 %v2347_v2  ;;  %v2060_v60 = vpack.c.bf16 %v1576_v59, %v1575_v58 }
 0x84f   :  { %v1374_v61 = vpop.f32.mrb[36].mxu1  ;;  %v1415_v62 = vpop.f32.mrb[44].mxu0 }
 0x850   :  { %v1422_v0 = vadd.f32 %v1374_v61, %v3326_v63  ;;  %v1424_v3 = vadd.f32 %v1415_v62, %v3327_v1  ;;  %v1376_v4 = vpop.f32.mrb[37].mxu1  ;;  %v1417_v5 = vpop.f32.mrb[45].mxu0  ;;  %v1591_v61 = vld [vmem:[%s3296_s6 + $0x40] sm:$0xff]  ;;  %v1592_v62 = vld [vmem:[%s3296_s6 + $0x48] sm:$0xff]  ;;  %v1578_v1 = vld [vmem:[%s3295_s5 + $0x58] sm:$0xff] }
 0x851   :  { %v1423_v7 = vadd.f32 %v1376_v4, %v3328_v6  ;;  %v1425_v9 = vadd.f32 %v1417_v5, %v3329_v8  ;;  %v1378_v10 = vpop.f32.mrb[38].mxu1  ;;  %v1419_v11 = vpop.f32.mrb[46].mxu0  ;;  %v2036_v63 = vpack.c.bf16 %v1592_v62, %v1591_v61  ;;  %v1594_v5 = vld [vmem:[%s3296_s6 + $0x58] sm:$0xff]  ;;  %v1579_v6 = vld [vmem:[%s3295_s5 + $0x60] sm:$0xff]  ;;  %v2349_v8 = vmov 0.0  }
 0x852   :  { %v1876_v56 = vmul.f32 -1.442695, %v1422_v0  ;;  %v1379_v57 = vpop.f32.mrb[39].mxu1  ;;  %v1420_v12 = vpop.f32.mrb[47].mxu0  ;;  %v1878_v14 = vmul.f32 -1.442695, %v1424_v3 }
 0x853   :  { %v1877_v13 = vmul.f32 -1.442695, %v1423_v7  ;;  %v1577_v0 = vld [vmem:[%s3295_s5 + $0x50] sm:$0xff]  ;;  %v1580_v7 = vld [vmem:[%s3295_s5 + $0x68] sm:$0xff]  ;;  %v1595_v10 = vld [vmem:[%s3296_s6 + $0x60] sm:$0xff] }
 0x854   :  { %2255 = vpow2.f32 %v1876_v56  ;;  %v1593_v3 = vld [vmem:[%s3296_s6 + $0x50] sm:$0xff]  ;;  %v2063_v4 = vpack.c.bf16 %v1578_v1, %v1577_v0  ;;  %v1596_v11 = vld [vmem:[%s3296_s6 + $0x68] sm:$0xff]  ;;  %v2066_v56 = vpack.c.bf16 %v1580_v7, %v1579_v6  ;;  %v1582_v12 = vld [vmem:[%s3295_s5 + $0x78] sm:$0xff] }
 0x855   :  { %2257 = vpow2.f32 %v1877_v13  ;;  %v1581_v57 = vld [vmem:[%s3295_s5 + $0x70] sm:$0xff]  ;;  %v2042_v13 = vpack.c.bf16 %v1596_v11, %v1595_v10 }
 0x856   :  { %2259 = vtanh.f32 %v1425_v9  ;;  %v2039_v9 = vpack.c.bf16 %v1594_v5, %v1593_v3 }
 0x857   :  { %2261 = vpow2.f32 %v1878_v14  ;;  %v1597_v14 = vld [vmem:[%s3296_s6 + $0x70] sm:$0xff] }
 0x85e   :  { %v2256_v15 = vpop.eup %2255 }
 0x85f   :  { %v1435_v16 = vadd.f32 1.0, %v2256_v15  ;;  %v2258_v17 = vpop.eup %2257  ;;  %v1598_v15 = vld [vmem:[%s3296_s6 + $0x78] sm:$0xff] }
 0x860   :  { %v1436_v18 = vadd.f32 1.0, %v2258_v17  ;;  %v2260_v19 = vpop.eup %2259  ;;  %v2045_v17 = vpack.c.bf16 %v1598_v15, %v1597_v14 }
 0x861   :  { %2263 = vrcp.f32 %v1435_v16  ;;  %v2262_v20 = vpop.eup %2261  ;;  %v2069_v16 = vpack.c.bf16 %v1582_v12, %v1581_v57 }
 0x862   :  { %2265 = vrcp.f32 %v1436_v18  ;;  %v1437_v34 = vadd.f32 1.0, %v2262_v20  ;;  %v3330_v20 = vld [vmem:[#allocation18_spill] sm:$0xff] }
 0x864   :  { %2267 = vrcp.f32 %v1437_v34 }
 0x86b   :  { %v2264_v21 = vpop.eup %2263 }
 0x86c   :  { %v1446_v22 = vmul.f32 %v2264_v21, %v2260_v19  ;;  %v2266_v25 = vpop.eup %2265 }
 0x86d   :  { %v1445_v49 = vmul.f32 %v2266_v25, %v3040_v23  ;;  %v1567_v23 = vld [vmem:[%s3295_s5] sm:$0xff] }
 0x86e   :  { %v2268_v26 = vpop.eup %2267  ;;  %v2048_v24 = vpack.c.bf16 %v1568_v37, %v1567_v23 }
 0x86f   :  { %v3146_v55 = vadd.f32 %v1446_v22, %v1445_v49  ;;  %v3331_v22 = vld [vmem:[#allocation19_spill] sm:$0xff] }
 0x871   :  { %2269 = vtanh.f32 %v3146_v55 }
 0x87b   :  { %v2270_v29 = vpop.eup %2269 }
 0x87c   :  { %v1449_v28 = vmul.f32 %v2270_v29, %v2268_v26  ;;  %v3332_v26 = vld [vmem:[#allocation20_spill] sm:$0xff] }
 0x87e   :  { %v1455_v30 = vpack.c.bf16 %v1449_v28, %v1449_v28  ;;  %v3152_v44 = vmax.f32 %v1334_v36, %v1449_v28  ;;  %v2024_v36 = vpack.c.bf16 %v1584_v32, %v1583_v38  ;;  %v3333_v28 = vld [vmem:[#allocation21_spill] sm:$0xff] }
 0x880   :  { %1489 = vmatmul.mubr.bf16.vlgmr.msra.gmra.mrb[40].mxu1 %v1455_v30  ;;  %1530 = vmatmul.mubr.bf16.vlgmr.msra.gmra.mrb[48].mxu0 %v1455_v30 }
 0x881   :  { %2049 = vmatpush3.bf16.msra.mxu0 %v2048_v24  ;;  %2025 = vmatpush3.bf16.msra.mxu1 %v2024_v36 }
 0x882   :  { %2050 = vmatprep.subr.bf16.mxu0 %v2347_v2  ;;  %2026 = vmatprep.subr.bf16.mxu1 %v2347_v2 }
 0x883   :  { %2020 = vmatprep.mubr.msk.f32.mxu0 %vm2348_vm13, %v2349_v8  ;;  %1985 = vmatprep.mubr.msk.f32.mxu1 %vm2348_vm13, %v2349_v8 }
 0x885   :  { %2052 = vmatpush3.bf16.msra.mxu0 %v2051_v43  ;;  %2028 = vmatpush3.bf16.msra.mxu1 %v2027_v31 }
 0x886   :  { %2053 = vmatprep.subr.bf16.mxu0 %v2347_v2  ;;  %2029 = vmatprep.subr.bf16.mxu1 %v2347_v2 }
 0x889   :  { %2055 = vmatpush3.bf16.msra.mxu0 %v2054_v46  ;;  %2031 = vmatpush3.bf16.msra.mxu1 %v2030_v47 }
 0x88a   :  { %2056 = vmatprep.subr.bf16.mxu0 %v2347_v2  ;;  %2032 = vmatprep.subr.bf16.mxu1 %v2347_v2 }
 0x88d   :  { %2058 = vmatpush3.bf16.msra.mxu0 %v2057_v52  ;;  %2034 = vmatpush3.bf16.msra.mxu1 %v2033_v42 }
 0x88e   :  { %2059 = vmatprep.subr.bf16.mxu0 %v2347_v2  ;;  %2035 = vmatprep.subr.bf16.mxu1 %v2347_v2 }
 0x891   :  { %2061 = vmatpush3.bf16.msra.mxu0 %v2060_v60  ;;  %2037 = vmatpush3.bf16.msra.mxu1 %v2036_v63  ;;  %v1882_v60 = vld [vmem:[%s3297_s7] ss:$0 sm:$0xff]  ;;  %s1770_s7 = sshll.u32 %s2350_s1, 4  ;;  %s1771_s7 = int_to_ptr.vmem [resolvable:$true] %s1770_s7 }
 0x892   :  { %2062 = vmatprep.subr.bf16.mxu0 %v2347_v2  ;;  %2038 = vmatprep.subr.bf16.mxu1 %v2347_v2  ;;  %s2321_s28 = scalar_lea.vmem %s1771_s7, 32  ;;  %p2326_p1 = scmp.lt.s32.totalorder %s1771_s7, %s1771_s7 }
 0x893   :  { %p2322_p0 = scmp.ne.s32.totalorder %s1771_s7, %s2321_s28  ;;  %p2327_p2 = scmp.lt.s32.totalorder %s2321_s28, %s2321_s28 }
 0x895   :  { %2064 = vmatpush3.bf16.msra.mxu0 %v2063_v4  ;;  %2040 = vmatpush3.bf16.msra.mxu1 %v2039_v9  ;;  %p2328_p3 = por %p2327_p2, %p2326_p1 }
 0x896   :  { %2065 = vmatprep.subr.bf16.mxu0 %v2347_v2  ;;  %2041 = vmatprep.subr.bf16.mxu1 %v2347_v2 }
 0x897   :  { %p2329_p4 = pnand %p2328_p3, %p2322_p0 }
 0x899   :  { %2067 = vmatpush3.bf16.msra.mxu0 %v2066_v56  ;;  %2043 = vmatpush3.bf16.msra.mxu1 %v2042_v13 }
 0x89a   :  { %2068 = vmatprep.subr.bf16.mxu0 %v2347_v2  ;;  %2044 = vmatprep.subr.bf16.mxu1 %v2347_v2 }
 0x89d   :  { %2070 = vmatpush3.bf16.msra.mxu0 %v2069_v16  ;;  %2046 = vmatpush3.bf16.msra.mxu1 %v2045_v17 }
 0x953   :  { %v1490_v18 = vpop.f32.mrb[40].mxu1  ;;  %v1531_v19 = vpop.f32.mrb[48].mxu0 }
 0x954   :  { %v1538_v21 = vadd.f32 %v1490_v18, %v3330_v20  ;;  %v1540_v25 = vadd.f32 %v1531_v19, %v3331_v22  ;;  %v1492_v34 = vpop.f32.mrb[41].mxu1  ;;  %v1533_v49 = vpop.f32.mrb[49].mxu0 }
 0x955   :  { %v1539_v29 = vadd.f32 %v1492_v34, %v3332_v26  ;;  %v1541_v30 = vadd.f32 %v1533_v49, %v3333_v28  ;;  %v1494_v23 = vpop.f32.mrb[42].mxu1  ;;  %v1535_v37 = vpop.f32.mrb[50].mxu0 }
 0x956   :  { %v1879_v24 = vmul.f32 -1.442695, %v1538_v21  ;;  %v1495_v38 = vpop.f32.mrb[43].mxu1  ;;  %v1536_v32 = vpop.f32.mrb[51].mxu0  ;;  %v1881_v36 = vmul.f32 -1.442695, %v1540_v25 }
 0x957   :  { %v1880_v2 = vmul.f32 -1.442695, %v1539_v29 }
 0x958   :  { %2271 = vpow2.f32 %v1879_v24 }
 0x959   :  { %2273 = vpow2.f32 %v1880_v2 }
 0x95a   :  { %2275 = vtanh.f32 %v1541_v30 }
 0x95b   :  { %2277 = vpow2.f32 %v1881_v36 }
 0x962   :  { %v2272_v41 = vpop.eup %2271 }
 0x963   :  { %v1551_v39 = vadd.f32 1.0, %v2272_v41  ;;  %v2274_v43 = vpop.eup %2273 }
 0x964   :  { %v1552_v54 = vadd.f32 1.0, %v2274_v43  ;;  %v2276_v48 = vpop.eup %2275 }
 0x965   :  { %2279 = vrcp.f32 %v1551_v39  ;;  %v2278_v31 = vpop.eup %2277 }
 0x966   :  { %2281 = vrcp.f32 %v1552_v54  ;;  %v1553_v45 = vadd.f32 1.0, %v2278_v31 }
 0x968   :  { %2283 = vrcp.f32 %v1553_v45 }
 0x96f   :  { %v2280_v40 = vpop.eup %2279 }
 0x970   :  { %v1562_v33 = vmul.f32 %v2280_v40, %v2276_v48  ;;  %v2282_v46 = vpop.eup %2281 }
 0x971   :  { %v1561_v50 = vmul.f32 %v2282_v46, %v3146_v55 }
 0x972   :  { %v2284_v51 = vpop.eup %2283 }
 0x973   :  { %v1563_v47 = vadd.f32 %v1562_v33, %v1561_v50 }
 0x975   :  { %2285 = vtanh.f32 %v1563_v47 }
 0x97f   :  { %v2286_v35 = vpop.eup %2285 }
 0x980   :  { %v1565_v52 = vmul.f32 %v2286_v35, %v2284_v51 }
 0x982   :  { %v1566_v27 = vmax.f32 %v3152_v44, %v1565_v52 }
 0x984   :  { %2021 = vmatmul.mubr.f32.vlgmr.msra.gmra.mrb[52].mxu0 %v1566_v27  ;;  %v1600_v53 = vrot.slane %v1566_v27, 2 }
 0x986   :  { %1986 = vmatmul.mubr.f32.vlgmr.msra.gmra.mrb[44].mxu1 %v1600_v53 }
 0xa57   :  { %v1738_v42 = vpop.f32.mrb[52].mxu0 }
 0xa58   :  { %v2022_v58 = vpop.f32.mrb[53].mxu0 }
 0xa59   :  { %v1668_v59 = vpop.f32.mrb[44].mxu1 }
 0xa5a   :  { %v1739_v61 = vadd.f32 %v1738_v42, %v1668_v59  ;;  %v1987_v55 = vpop.f32.mrb[45].mxu1 }
 0xa5c   :  { %v1749_v62 = vadd.f32 %v1882_v60, %v1739_v61 }
 0xa5e   :  { %v1751_v63 = vsel %vm1750_vm14, %v1749_v62, -inf }
 0xa5f   :  { %1752 = vmax.xlane.f32.xlu0 %v1751_v63 }
 0xaec   :  { %v1753_v0 = vpop.xlane.xlu0 %1752 }
 0xaed   :  { %v1754_v1 = vsub.f32 %v1749_v62, %v1753_v0 }
 0xaef   :  { %v1755_v44 = vmul.f32 1.442695, %v1754_v1 }
 0xaf1   :  { %2287 = vpow2.f32 %v1755_v44 }
 0xafb   :  { %v2288_v3 = vpop.eup %2287 }
 0xafc   :  { %v1757_v4 = vsel %vm1750_vm14, %v2288_v3, 0.0 }
 0xafd   :  { %1758 = vadd.xlane.f32.xlu1 %v1757_v4 }
 0xb8a   :  { %v1759_v5 = vpop.xlane.xlu1 %1758 }
 0xb8b   :  { %2289 = vlog2.f32 %v1759_v5 }
 0xb95   :  { %v2290_v6 = vpop.eup %2289 }
 0xb96   :  { %v1761_v7 = vmul.f32 0.6931472, %v2290_v6 }
 0xb98   :  { %v1762_v8 = vsub.f32 %v1754_v1, %v1761_v7 }
 0xb9a   :  { %1763 = vst.msk [vmem:[#allocation3] sm:$0x3] %vm1750_vm14, %v1762_v8 }
 0xb9b   :  { %2332 = shalt.err (!%p2329_p4)
}
 0xb9c   :  { %s2333_s9 = scalar_lea.hbm %s3298_s8, 32 }
 0xb9d   :  { %p2334_p5 = scmp.ne.s32.totalorder %s3298_s8, %s2333_s9  ;;  %p2337_p6 = scmp.lt.u32.totalorder %s2333_s9, %s3298_s8 }
 0xb9f   :  { %p2339_p7 = pnand %p2337_p6, %p2334_p5 }
 0xba1   :  { %2342 = shalt.err (!%p2339_p7)
}
 0xba2   :  { %1773 = dma.vmem_to_hbm [thread:$0]  %s1771_s7, 32, %s3298_s8, [#allocation4]  }
 0xba3   :  { %2343 = dma.done.wait [#allocation4], 32  }
 0xba4   :  { %2344 = vsyncadd [#allocation4], 4294967264 }
 0xba5   :  { %1777 = vsyncpa [#allocation4], 1 }

</bundles_post_ra>
